<compile_context>
chip_gen: v5e
topology: v5e:2x2
jax: 0.10.0
libtpu: 0.0.40
codegen_flags: <defaults>
</compile_context>

<pallas_src>
import functools

import numpy as np
import jax
import jax.numpy as jnp
from jax import lax
from jax.experimental import pallas as pl
from jax.experimental.pallas import tpu as pltpu


_EPS = 0.005
_CLAMP_HI = float(np.finfo(np.float16).max) * (1.0 - _EPS)
_CLAMP_LO = float(np.finfo(np.float16).min) * (1.0 - _EPS)


def _align(v, m):
    """Attach a divisibility hint to traced offsets; pass python ints through."""
    return v if isinstance(v, (int, np.integer)) else pl.multiple_of(v, m)


def _device_kind():
    try:
        return jax.devices()[0].device_kind.lower()
    except Exception:
        return ""


def _vmem_capacity_bytes():
    try:
        return int(pltpu.get_tpu_info().vmem_capacity_bytes)
    except Exception:
        return 64 * 1024 * 1024          # conservative fallback (v7x per-TC VMEM)


def _tree_dtype(kind):
    # bf16 select tree only where the VPU has a native bf16 VALU (v6e / v7x); f32 elsewhere.
    return jnp.bfloat16 if ("v6" in kind or "v7" in kind or "7x" in kind) else jnp.float32


def _pick_tk(K):
    """Matmul/decode K-chunk size: multiple of 128 (lane-aligned x slices), MXU-friendly."""
    if K <= 512:
        return K
    for cand in (512, 256, 128):
        if K % cand == 0:
            return cand
    return K                             # odd K: single chunk (still correct)


def _pick_wc(tn, w_bits, tk, tree_dtype):
    """Words per decode sub-chunk, sized so live select-tree intermediates stay ~<=32 vregs."""
    tb = 2 if tree_dtype == jnp.bfloat16 else 4
    live = max(1, 2 ** (w_bits - 1)) * 32 * tn * tb      # bytes live per word of chunk
    wc = 2 if (128 * 1024) // live >= 2 else 1
    while (tk // 32) % wc:
        wc -= 1
    return max(1, wc)


def _choose_tiles(M, K, Np, w_bits, tk, budget, two_core):
    """Pick (tm, tn) against the per-chip VMEM budget; prefer lane-wide tn (cuts x re-fetch
    HBM traffic for prefill) and, on dual-core chips, an even N-tile count >= 2 (megacore)."""
    n_lut = 2 ** w_bits
    W = K // 32
    n_k = max(1, K // tk)
    tm_cands = [M] if M <= 512 else [512, 256, 128]
    tn_cands = [t for t in (512, 256, 128) if Np % t == 0] or [Np]

    def stats(tm, tn):
        mp = -(-M // tm) * tm
        m_tiles = mp // tm
        wt_rows = K if m_tiles > 1 else min(2, n_k) * tk
        ws = (2 * tm * K * 2                      # x tile (bf16, double-buffered)
              + 2 * w_bits * W * tn * 4           # bit-plane tile (double-buffered)
              + 2 * n_lut * tn * 4 + 2 * tn * 4   # LUT + bias tiles
              + 2 * tm * tn * 2                   # out tile (double-buffered)
              + wt_rows * tn * 2                  # decoded-weight scratch
              + tm * tn * 4)                      # f32 accumulator scratch
        return mp, ws

    cands = []
    for tm in tm_cands:
        for tn in tn_cands:
            mp, ws = stats(tm, tn)
            nt = Np // tn
            if two_core:
                score = (ws <= budget, nt >= 2, nt % 2 == 0, tn, -mp, tm, -ws)
            else:
                score = (ws <= budget, tn, -mp, tm, -ws)
            cands.append((score, tm, tn, mp, ws))
    best = max(cands, key=lambda c: c[0])
    if not best[0][0]:                            # nothing fits: smallest footprint
        best = min(cands, key=lambda c: c[4])
    _, tm, tn, mp, ws = best
    return tm, tn, mp, ws


def _any_precision_kernel(w_bits, wc, tk, multi_m, clamp_lo, clamp_hi, tree_dtype,
                          x_ref, qwt_ref, lut_ref, bias_ref, out_ref, wt_ref, acc_ref):
    """One (n, m) grid step.

    m == 0 (or single-m grids): fused dequant + matmul.  K is processed in tk-feature chunks;
    each chunk is decoded with a LUT select tree (VALU) and immediately matmul-accumulated
    (MXU), so chunk c's matmul overlaps chunk c+1's decode.  Decoded weights also land in the
    persistent VMEM scratch.

    m > 0: plain full-K matmul against the scratch decoded at m == 0.
    """
    tm, K = x_ref.shape
    tn = out_ref.shape[-1]
    n_lut = 2 ** w_bits
    words_per_tk = tk // 32
    sub_chunks = words_per_tk // wc
    n_k = K // tk

    def fused_dequant_matmul():
        # Hoisted once per N tile (loop-invariant): LUT candidates + bit-position shifts.
        lut = lut_ref[...].astype(tree_dtype)                       # (2**w_bits, tn)
        cands = [lut[c][None, None, :] for c in range(n_lut)]       # (1, 1, tn) each
        shifts = 31 - lax.broadcasted_iota(jnp.int32, (wc, 32, tn), 1)

        def dequant_words(base_w):
            """Decode wc packed int32 words (= wc*32 input features) -> (wc, 32, tn) bf16."""
            vals = cands
            for b in range(w_bits):
                # Lazy bit-plane extraction (one mask live): shift target bit to the sign
                # position, then compare -- 2 VPU ops per plane.
                words = qwt_ref[b, pl.ds(base_w, wc), :]            # (wc, tn) int32
                mask = jnp.left_shift(words[:, None, :], shifts) < 0
                vals = [jnp.where(mask, vals[2 * i + 1], vals[2 * i])
                        for i in range(len(vals) // 2)]
            return vals[0].astype(jnp.bfloat16)                     # (wc, 32, tn)

        def k_step(kc):
            w_base = kc * words_per_tk               # word offset into the bit-plane tile
            f_base = kc * tk                         # feature offset into x / full scratch
            base = f_base if multi_m else ((kc & 1) * tk if n_k > 1 else 0)
            for s in range(sub_chunks):
                part = dequant_words(_align(w_base + s * wc, wc))
                for r in range(wc):
                    off = _align(base + (s * wc + r) * 32, 32)
                    wt_ref[pl.ds(off, 32), :] = part[r]
            xc = x_ref[:, pl.ds(_align(f_base, tk), tk)]
            wk = wt_ref[pl.ds(_align(base, tk), tk), :]
            acc_ref[...] += jnp.dot(xc, wk, preferred_element_type=jnp.float32)

        acc_ref[...] = jnp.zeros_like(acc_ref)
        if n_k <= 4:
            for kc in range(n_k):                    # fully static offsets for small K
                k_step(kc)
        else:
            def body(kc, carry):
                k_step(kc)
                return carry
            lax.fori_loop(0, n_k, body, 0, unroll=2 if n_k % 2 == 0 else 1)

        y = acc_ref[...] + bias_ref[...]
        out_ref[...] = jnp.clip(y, clamp_lo, clamp_hi).astype(out_ref.dtype)

    def matmul_from_scratch():
        y = jnp.dot(x_ref[...], wt_ref[...], preferred_element_type=jnp.float32)
        y = y + bias_ref[...]
        out_ref[...] = jnp.clip(y, clamp_lo, clamp_hi).astype(out_ref.dtype)

    if multi_m:
        first_m = pl.program_id(1) == 0              # m is innermost: decode once per N tile
        pl.when(first_m)(fused_dequant_matmul)
        pl.when(jnp.logical_not(first_m))(matmul_from_scratch)
    else:
        fused_dequant_matmul()


def prepare_any_precision_weights(qweight, lut, bias, w_bits, pad_to=256):
    """One-time (weight-load time) layout prep so the hot path does no HBM transposes:
      * keep the first w_bits bit planes, word-transpose so lanes carry out_features,
      * LUT transposed + promoted to f32, bias as a (1, N) f32 row,
      * pad the out_features axis to a multiple of `pad_to` (lane-dense stores everywhere,
        even N-tile count for v7x megacore); the wrapper slices the output back.
    Returns (qwt, lut_t, bias_row, out_features)."""
    n_out = qweight.shape[1]
    n_pad = -(-n_out // pad_to) * pad_to
    qwt = jnp.transpose(qweight[:w_bits], (0, 2, 1)).astype(jnp.int32)   # (w_bits, K//32, N)
    lut_t = jnp.transpose(lut, (1, 0)).astype(jnp.float32)               # (2**w_bits, N)
    if bias is None:
        bias_row = jnp.zeros((1, n_out), jnp.float32)
    else:
        bias_row = jnp.asarray(bias, jnp.float32).reshape(1, n_out)
    if n_pad != n_out:
        qwt = jnp.pad(qwt, ((0, 0), (0, 0), (0, n_pad - n_out)))
        lut_t = jnp.pad(lut_t, ((0, 0), (0, n_pad - n_out)))
        bias_row = jnp.pad(bias_row, ((0, 0), (0, n_pad - n_out)))
    return qwt, lut_t, bias_row, n_out


def any_precision_linear(x, qwt, lut_t, bias_row, w_bits, out_features=None):
    """x: (..., K); qwt: (w_bits, K//32, Np) int32 pre-transposed bit planes; lut_t:
    (2**w_bits, Np) f32; bias_row: (1, Np) f32 (Np = out_features padded to 128/256).
    Returns (..., out_features) in x.dtype."""
    orig_shape = x.shape
    K = orig_shape[-1]
    wb, W, Np = qwt.shape
    n_lut = 2 ** w_bits
    assert wb == w_bits and lut_t.shape == (n_lut, Np) and bias_row.shape == (1, Np)
    assert K % 32 == 0 and W * 32 == K, "in_features must be a multiple of 32"
    assert Np % 128 == 0, "use prepare_any_precision_weights (lane-dense out_features)"
    n_out = Np if out_features is None else int(out_features)

    M = int(np.prod(orig_shape[:-1]))
    x2 = x.reshape(M, K)
    if x2.dtype != jnp.bfloat16:
        # TODO(synk): cast in-kernel once Mosaic f16 vector loads are universally supported.
        x2 = x2.astype(jnp.bfloat16)

    kind = _device_kind()
    tree_dtype = _tree_dtype(kind)
    two_core = ("v7" in kind or "7x" in kind)
    cap = _vmem_capacity_bytes()
    budget = int(cap * 0.7)

    tk = _pick_tk(K)
    tm, tn, mp, ws = _choose_tiles(M, K, Np, w_bits, tk, budget, two_core)
    wc = _pick_wc(tn, w_bits, tk, tree_dtype)
    vmem_limit = int(min(int(cap * 0.9), max(32 << 20, ws + (16 << 20))))

    if mp != M:                                     # only for M > 512 and not tile-divisible
        x2 = jnp.pad(x2, ((0, mp - M), (0, 0)))

    m_tiles = mp // tm
    multi_m = m_tiles > 1
    n_k = K // tk
    wt_rows = K if multi_m else min(2, n_k) * tk    # ring of 2 chunk slots when no m-reuse

    kernel = functools.partial(_any_precision_kernel, w_bits, wc, tk, multi_m,
                               _CLAMP_LO, _CLAMP_HI, tree_dtype)

    y = pl.pallas_call(
        kernel,
        out_shape=jax.ShapeDtypeStruct((mp, Np), jnp.bfloat16),
        grid_spec=pltpu.PrefetchScalarGridSpec(
            num_scalar_prefetch=0,
            grid=(Np // tn, m_tiles),                                   # (n, m) -- m innermost
            in_specs=[
                pl.BlockSpec((tm, K), lambda n, m: (m, 0)),             # x tile (bf16)
                pl.BlockSpec((w_bits, W, tn), lambda n, m: (0, 0, n)),  # bit planes (per N)
                pl.BlockSpec((n_lut, tn), lambda n, m: (0, n)),         # LUT (per N)
                pl.BlockSpec((1, tn), lambda n, m: (0, n)),             # bias row (per N)
            ],
            out_specs=pl.BlockSpec((tm, tn), lambda n, m: (m, n)),
            scratch_shapes=[pltpu.VMEM((wt_rows, tn), jnp.bfloat16),    # decoded weight.T
                            pltpu.VMEM((tm, tn), jnp.float32)],         # f32 accumulator
        ),
        compiler_params=pltpu.CompilerParams(
            dimension_semantics=("parallel", "arbitrary"),
            vmem_limit_bytes=vmem_limit),
    )(x2, qwt, lut_t, bias_row)

    # TODO(synk): emit float16 directly from the kernel once Mosaic fp16 stores are universal.
    return y[:M, :n_out].astype(x.dtype).reshape(*orig_shape[:-1], n_out)


if __name__ == "__main__":
    B, S = 2, 8                       # M = 16 > 8 -> module's dequant+matmul branch
    in_features, out_features = 128, 128
    supported_bits = [2, 3]
    w_bits = max(supported_bits)      # self.precision = max(precisions)

    key = jax.random.PRNGKey(0)
    kx, kc, kl, kb = jax.random.split(key, 4)

    x = (jax.random.normal(kx, (B, S, in_features), jnp.float32) * 0.5).astype(jnp.float16)

    # synthetic quantized weights: random w_bits codes packed into int32 bit planes
    codes = np.asarray(
        jax.random.randint(kc, (out_features, in_features), 0, 2 ** w_bits), dtype=np.uint32)
    shifts = np.arange(32, dtype=np.uint32)
    planes = []
    for b in range(max(supported_bits)):
        bits = ((codes >> b) & 1).reshape(out_features, in_features // 32, 32)
        word = np.bitwise_or.reduce(bits << shifts, axis=-1).astype(np.uint32)
        planes.append(word.view(np.int32))
    qweight = jnp.asarray(np.stack(planes, axis=0))            # (max_bits, N, K//32) int32

    lut = (jax.random.normal(kl, (out_features, 2 ** w_bits), jnp.float32) * 0.05
           ).astype(jnp.float16)                               # lut{w_bits}
    bias = (jax.random.normal(kb, (out_features,), jnp.float32) * 0.1).astype(jnp.float16)

    # one-time weight-load-time layout prep (not in the hot path)
    qwt, lut_t, bias_row, n_out = prepare_any_precision_weights(qweight, lut, bias, w_bits)

    y = any_precision_linear(x, qwt, lut_t, bias_row, w_bits, out_features=n_out)
    y = jax.block_until_ready(y)

    # pure numpy reference: dequant -> matmul -> bias -> clamp (forward semantics)
    weight = np.asarray(lut, np.float32)[np.arange(out_features)[:, None],
                                         codes.astype(np.int64)]
    ref = np.asarray(x, np.float32).reshape(B * S, in_features) @ weight.T
    ref = ref + np.asarray(bias, np.float32)[None, :]
    ref = np.clip(ref, _CLAMP_LO, _CLAMP_HI).reshape(B, S, out_features)

    assert y.shape == (B, S, out_features) and y.dtype == jnp.float16
    np.testing.assert_allclose(np.asarray(y, np.float32), ref, rtol=3e-2, atol=3e-2)
    print("KERNEL_OK")
</pallas_src>

<mosaic_0001>
module attributes {stable_mosaic.version = 11 : i64} {
  func.func @_any_precision_kernel(%arg0: i32, %arg1: i32, %arg2: memref<16x128xbf16, #tpu.memory_space<vmem>>, %arg3: memref<3x4x256xi32, #tpu.memory_space<vmem>>, %arg4: memref<8x256xf32, #tpu.memory_space<vmem>>, %arg5: memref<1x256xf32, #tpu.memory_space<vmem>>, %arg6: memref<16x256xbf16, #tpu.memory_space<vmem>>, %arg7: memref<128x256xbf16, #tpu.memory_space<vmem>>, %arg8: memref<16x256xf32, #tpu.memory_space<vmem>>) attributes {dimension_semantics = [#tpu.dimension_semantics<parallel>, #tpu.dimension_semantics<arbitrary>], iteration_bounds = array<i64: 1, 1>, scalar_prefetch = 0 : i64, scratch_operands = 2 : i64, tpu.core_type = #tpu.core_type<tc>, window_params = [{transform_indices = @transform_0, window_bounds = array<i64: 16, 128>}, {transform_indices = @transform_1, window_bounds = array<i64: 3, 4, 256>}, {transform_indices = @transform_2, window_bounds = array<i64: 8, 256>}, {transform_indices = @transform_3, window_bounds = array<i64: 1, 256>}, {transform_indices = @transform_4, window_bounds = array<i64: 16, 256>}]} {
    %c0 = arith.constant 0 : index
    %c0_0 = arith.constant 0 : index
    %0 = vector.load %arg4[%c0, %c0_0] : memref<8x256xf32, #tpu.memory_space<vmem>>, vector<8x256xf32>
    %1 = vector.extract_strided_slice %0 {offsets = [0, 0], sizes = [1, 256], strides = [1, 1]} : vector<8x256xf32> to vector<1x256xf32>
    %2 = vector.shape_cast %1 : vector<1x256xf32> to vector<256xf32>
    %3 = vector.shape_cast %2 : vector<256xf32> to vector<1x1x256xf32>
    %4 = vector.extract_strided_slice %0 {offsets = [1, 0], sizes = [1, 256], strides = [1, 1]} : vector<8x256xf32> to vector<1x256xf32>
    %5 = vector.shape_cast %4 : vector<1x256xf32> to vector<256xf32>
    %6 = vector.shape_cast %5 : vector<256xf32> to vector<1x1x256xf32>
    %7 = vector.extract_strided_slice %0 {offsets = [2, 0], sizes = [1, 256], strides = [1, 1]} : vector<8x256xf32> to vector<1x256xf32>
    %8 = vector.shape_cast %7 : vector<1x256xf32> to vector<256xf32>
    %9 = vector.shape_cast %8 : vector<256xf32> to vector<1x1x256xf32>
    %10 = vector.extract_strided_slice %0 {offsets = [3, 0], sizes = [1, 256], strides = [1, 1]} : vector<8x256xf32> to vector<1x256xf32>
    %11 = vector.shape_cast %10 : vector<1x256xf32> to vector<256xf32>
    %12 = vector.shape_cast %11 : vector<256xf32> to vector<1x1x256xf32>
    %13 = vector.extract_strided_slice %0 {offsets = [4, 0], sizes = [1, 256], strides = [1, 1]} : vector<8x256xf32> to vector<1x256xf32>
    %14 = vector.shape_cast %13 : vector<1x256xf32> to vector<256xf32>
    %15 = vector.shape_cast %14 : vector<256xf32> to vector<1x1x256xf32>
    %16 = vector.extract_strided_slice %0 {offsets = [5, 0], sizes = [1, 256], strides = [1, 1]} : vector<8x256xf32> to vector<1x256xf32>
    %17 = vector.shape_cast %16 : vector<1x256xf32> to vector<256xf32>
    %18 = vector.shape_cast %17 : vector<256xf32> to vector<1x1x256xf32>
    %19 = vector.extract_strided_slice %0 {offsets = [6, 0], sizes = [1, 256], strides = [1, 1]} : vector<8x256xf32> to vector<1x256xf32>
    %20 = vector.shape_cast %19 : vector<1x256xf32> to vector<256xf32>
    %21 = vector.shape_cast %20 : vector<256xf32> to vector<1x1x256xf32>
    %22 = vector.extract_strided_slice %0 {offsets = [7, 0], sizes = [1, 256], strides = [1, 1]} : vector<8x256xf32> to vector<1x256xf32>
    %23 = vector.shape_cast %22 : vector<1x256xf32> to vector<256xf32>
    %24 = vector.shape_cast %23 : vector<256xf32> to vector<1x1x256xf32>
    %25 = tpu.iota {dimensions = array<i32: 1>} : vector<1x32x256xi32>
    %c31_i32 = arith.constant 31 : i32
    %26 = vector.broadcast %c31_i32 : i32 to vector<1x32x256xi32>
    %27 = arith.subi %26, %25 : vector<1x32x256xi32>
    %cst = arith.constant 0.000000e+00 : f32
    %28 = vector.broadcast %cst : f32 to vector<16x256xf32>
    %c0_1 = arith.constant 0 : index
    %c0_2 = arith.constant 0 : index
    %29 = vector.load %arg8[%c0_1, %c0_2] : memref<16x256xf32, #tpu.memory_space<vmem>>, vector<16x256xf32>
    tpu.vector_store %arg8[%c0_1, %c0_2], %28 {strides = array<i32>} : memref<16x256xf32, #tpu.memory_space<vmem>>, vector<16x256xf32>,
    %c0_3 = arith.constant 0 : index
    %c0_4 = arith.constant 0 : index
    %c0_5 = arith.constant 0 : index
    %30 = vector.load %arg3[%c0_3, %c0_4, %c0_5] : memref<3x4x256xi32, #tpu.memory_space<vmem>>, vector<1x1x256xi32>
    %31 = vector.shape_cast %30 : vector<1x1x256xi32> to vector<1x256xi32>
    %32 = vector.shape_cast %31 : vector<1x256xi32> to vector<1x1x256xi32>
    %33 = vector.broadcast %32 : vector<1x1x256xi32> to vector<1x32x256xi32>
    %34 = arith.shli %33, %27 : vector<1x32x256xi32>
    %c0_i32 = arith.constant 0 : i32
    %35 = vector.broadcast %c0_i32 : i32 to vector<1x32x256xi32>
    %36 = arith.cmpi slt, %34, %35 : vector<1x32x256xi32>
    %37 = vector.shape_cast %6 : vector<1x1x256xf32> to vector<1x1x256xf32>
    %38 = vector.broadcast %37 : vector<1x1x256xf32> to vector<1x32x256xf32>
    %39 = vector.shape_cast %3 : vector<1x1x256xf32> to vector<1x1x256xf32>
    %40 = vector.broadcast %39 : vector<1x1x256xf32> to vector<1x32x256xf32>
    %41 = arith.select %36, %38, %40 : vector<1x32x256xi1>, vector<1x32x256xf32>
    %42 = vector.shape_cast %12 : vector<1x1x256xf32> to vector<1x1x256xf32>
    %43 = vector.broadcast %42 : vector<1x1x256xf32> to vector<1x32x256xf32>
    %44 = vector.shape_cast %9 : vector<1x1x256xf32> to vector<1x1x256xf32>
    %45 = vector.broadcast %44 : vector<1x1x256xf32> to vector<1x32x256xf32>
    %46 = arith.select %36, %43, %45 : vector<1x32x256xi1>, vector<1x32x256xf32>
    %47 = vector.shape_cast %18 : vector<1x1x256xf32> to vector<1x1x256xf32>
    %48 = vector.broadcast %47 : vector<1x1x256xf32> to vector<1x32x256xf32>
    %49 = vector.shape_cast %15 : vector<1x1x256xf32> to vector<1x1x256xf32>
    %50 = vector.broadcast %49 : vector<1x1x256xf32> to vector<1x32x256xf32>
    %51 = arith.select %36, %48, %50 : vector<1x32x256xi1>, vector<1x32x256xf32>
    %52 = vector.shape_cast %24 : vector<1x1x256xf32> to vector<1x1x256xf32>
    %53 = vector.broadcast %52 : vector<1x1x256xf32> to vector<1x32x256xf32>
    %54 = vector.shape_cast %21 : vector<1x1x256xf32> to vector<1x1x256xf32>
    %55 = vector.broadcast %54 : vector<1x1x256xf32> to vector<1x32x256xf32>
    %56 = arith.select %36, %53, %55 : vector<1x32x256xi1>, vector<1x32x256xf32>
    %c1 = arith.constant 1 : index
    %c0_6 = arith.constant 0 : index
    %c0_7 = arith.constant 0 : index
    %57 = vector.load %arg3[%c1, %c0_6, %c0_7] : memref<3x4x256xi32, #tpu.memory_space<vmem>>, vector<1x1x256xi32>
    %58 = vector.shape_cast %57 : vector<1x1x256xi32> to vector<1x256xi32>
    %59 = vector.shape_cast %58 : vector<1x256xi32> to vector<1x1x256xi32>
    %60 = vector.broadcast %59 : vector<1x1x256xi32> to vector<1x32x256xi32>
    %61 = arith.shli %60, %27 : vector<1x32x256xi32>
    %c0_i32_8 = arith.constant 0 : i32
    %62 = vector.broadcast %c0_i32_8 : i32 to vector<1x32x256xi32>
    %63 = arith.cmpi slt, %61, %62 : vector<1x32x256xi32>
    %64 = arith.select %63, %46, %41 : vector<1x32x256xi1>, vector<1x32x256xf32>
    %65 = arith.select %63, %56, %51 : vector<1x32x256xi1>, vector<1x32x256xf32>
    %c2 = arith.constant 2 : index
    %c0_9 = arith.constant 0 : index
    %c0_10 = arith.constant 0 : index
    %66 = vector.load %arg3[%c2, %c0_9, %c0_10] : memref<3x4x256xi32, #tpu.memory_space<vmem>>, vector<1x1x256xi32>
    %67 = vector.shape_cast %66 : vector<1x1x256xi32> to vector<1x256xi32>
    %68 = vector.shape_cast %67 : vector<1x256xi32> to vector<1x1x256xi32>
    %69 = vector.broadcast %68 : vector<1x1x256xi32> to vector<1x32x256xi32>
    %70 = arith.shli %69, %27 : vector<1x32x256xi32>
    %c0_i32_11 = arith.constant 0 : i32
    %71 = vector.broadcast %c0_i32_11 : i32 to vector<1x32x256xi32>
    %72 = arith.cmpi slt, %70, %71 : vector<1x32x256xi32>
    %73 = arith.select %72, %65, %64 : vector<1x32x256xi1>, vector<1x32x256xf32>
    %74 = arith.truncf %73 : vector<1x32x256xf32> to vector<1x32x256xbf16>
    %75 = vector.shape_cast %74 : vector<1x32x256xbf16> to vector<32x256xbf16>
    %c0_12 = arith.constant 0 : index
    %c0_13 = arith.constant 0 : index
    %76 = vector.load %arg7[%c0_12, %c0_13] : memref<128x256xbf16, #tpu.memory_space<vmem>>, vector<32x256xbf16>
    tpu.vector_store %arg7[%c0_12, %c0_13], %75 {strides = array<i32>} : memref<128x256xbf16, #tpu.memory_space<vmem>>, vector<32x256xbf16>,
    %c0_14 = arith.constant 0 : index
    %c1_15 = arith.constant 1 : index
    %c0_16 = arith.constant 0 : index
    %77 = vector.load %arg3[%c0_14, %c1_15, %c0_16] : memref<3x4x256xi32, #tpu.memory_space<vmem>>, vector<1x1x256xi32>
    %78 = vector.shape_cast %77 : vector<1x1x256xi32> to vector<1x256xi32>
    %79 = vector.shape_cast %78 : vector<1x256xi32> to vector<1x1x256xi32>
    %80 = vector.broadcast %79 : vector<1x1x256xi32> to vector<1x32x256xi32>
    %81 = arith.shli %80, %27 : vector<1x32x256xi32>
    %c0_i32_17 = arith.constant 0 : i32
    %82 = vector.broadcast %c0_i32_17 : i32 to vector<1x32x256xi32>
    %83 = arith.cmpi slt, %81, %82 : vector<1x32x256xi32>
    %84 = vector.shape_cast %6 : vector<1x1x256xf32> to vector<1x1x256xf32>
    %85 = vector.broadcast %84 : vector<1x1x256xf32> to vector<1x32x256xf32>
    %86 = vector.shape_cast %3 : vector<1x1x256xf32> to vector<1x1x256xf32>
    %87 = vector.broadcast %86 : vector<1x1x256xf32> to vector<1x32x256xf32>
    %88 = arith.select %83, %85, %87 : vector<1x32x256xi1>, vector<1x32x256xf32>
    %89 = vector.shape_cast %12 : vector<1x1x256xf32> to vector<1x1x256xf32>
    %90 = vector.broadcast %89 : vector<1x1x256xf32> to vector<1x32x256xf32>
    %91 = vector.shape_cast %9 : vector<1x1x256xf32> to vector<1x1x256xf32>
    %92 = vector.broadcast %91 : vector<1x1x256xf32> to vector<1x32x256xf32>
    %93 = arith.select %83, %90, %92 : vector<1x32x256xi1>, vector<1x32x256xf32>
    %94 = vector.shape_cast %18 : vector<1x1x256xf32> to vector<1x1x256xf32>
    %95 = vector.broadcast %94 : vector<1x1x256xf32> to vector<1x32x256xf32>
    %96 = vector.shape_cast %15 : vector<1x1x256xf32> to vector<1x1x256xf32>
    %97 = vector.broadcast %96 : vector<1x1x256xf32> to vector<1x32x256xf32>
    %98 = arith.select %83, %95, %97 : vector<1x32x256xi1>, vector<1x32x256xf32>
    %99 = vector.shape_cast %24 : vector<1x1x256xf32> to vector<1x1x256xf32>
    %100 = vector.broadcast %99 : vector<1x1x256xf32> to vector<1x32x256xf32>
    %101 = vector.shape_cast %21 : vector<1x1x256xf32> to vector<1x1x256xf32>
    %102 = vector.broadcast %101 : vector<1x1x256xf32> to vector<1x32x256xf32>
    %103 = arith.select %83, %100, %102 : vector<1x32x256xi1>, vector<1x32x256xf32>
    %c1_18 = arith.constant 1 : index
    %c1_19 = arith.constant 1 : index
    %c0_20 = arith.constant 0 : index
    %104 = vector.load %arg3[%c1_18, %c1_19, %c0_20] : memref<3x4x256xi32, #tpu.memory_space<vmem>>, vector<1x1x256xi32>
    %105 = vector.shape_cast %104 : vector<1x1x256xi32> to vector<1x256xi32>
    %106 = vector.shape_cast %105 : vector<1x256xi32> to vector<1x1x256xi32>
    %107 = vector.broadcast %106 : vector<1x1x256xi32> to vector<1x32x256xi32>
    %108 = arith.shli %107, %27 : vector<1x32x256xi32>
    %c0_i32_21 = arith.constant 0 : i32
    %109 = vector.broadcast %c0_i32_21 : i32 to vector<1x32x256xi32>
    %110 = arith.cmpi slt, %108, %109 : vector<1x32x256xi32>
    %111 = arith.select %110, %93, %88 : vector<1x32x256xi1>, vector<1x32x256xf32>
    %112 = arith.select %110, %103, %98 : vector<1x32x256xi1>, vector<1x32x256xf32>
    %c2_22 = arith.constant 2 : index
    %c1_23 = arith.constant 1 : index
    %c0_24 = arith.constant 0 : index
    %113 = vector.load %arg3[%c2_22, %c1_23, %c0_24] : memref<3x4x256xi32, #tpu.memory_space<vmem>>, vector<1x1x256xi32>
    %114 = vector.shape_cast %113 : vector<1x1x256xi32> to vector<1x256xi32>
    %115 = vector.shape_cast %114 : vector<1x256xi32> to vector<1x1x256xi32>
    %116 = vector.broadcast %115 : vector<1x1x256xi32> to vector<1x32x256xi32>
    %117 = arith.shli %116, %27 : vector<1x32x256xi32>
    %c0_i32_25 = arith.constant 0 : i32
    %118 = vector.broadcast %c0_i32_25 : i32 to vector<1x32x256xi32>
    %119 = arith.cmpi slt, %117, %118 : vector<1x32x256xi32>
    %120 = arith.select %119, %112, %111 : vector<1x32x256xi1>, vector<1x32x256xf32>
    %121 = arith.truncf %120 : vector<1x32x256xf32> to vector<1x32x256xbf16>
    %122 = vector.shape_cast %121 : vector<1x32x256xbf16> to vector<32x256xbf16>
    %c32 = arith.constant 32 : index
    %c0_26 = arith.constant 0 : index
    %123 = vector.load %arg7[%c32, %c0_26] : memref<128x256xbf16, #tpu.memory_space<vmem>>, vector<32x256xbf16>
    tpu.vector_store %arg7[%c32, %c0_26], %122 {strides = array<i32>} : memref<128x256xbf16, #tpu.memory_space<vmem>>, vector<32x256xbf16>,
    %c0_27 = arith.constant 0 : index
    %c2_28 = arith.constant 2 : index
    %c0_29 = arith.constant 0 : index
    %124 = vector.load %arg3[%c0_27, %c2_28, %c0_29] : memref<3x4x256xi32, #tpu.memory_space<vmem>>, vector<1x1x256xi32>
    %125 = vector.shape_cast %124 : vector<1x1x256xi32> to vector<1x256xi32>
    %126 = vector.shape_cast %125 : vector<1x256xi32> to vector<1x1x256xi32>
    %127 = vector.broadcast %126 : vector<1x1x256xi32> to vector<1x32x256xi32>
    %128 = arith.shli %127, %27 : vector<1x32x256xi32>
    %c0_i32_30 = arith.constant 0 : i32
    %129 = vector.broadcast %c0_i32_30 : i32 to vector<1x32x256xi32>
    %130 = arith.cmpi slt, %128, %129 : vector<1x32x256xi32>
    %131 = vector.shape_cast %6 : vector<1x1x256xf32> to vector<1x1x256xf32>
    %132 = vector.broadcast %131 : vector<1x1x256xf32> to vector<1x32x256xf32>
    %133 = vector.shape_cast %3 : vector<1x1x256xf32> to vector<1x1x256xf32>
    %134 = vector.broadcast %133 : vector<1x1x256xf32> to vector<1x32x256xf32>
    %135 = arith.select %130, %132, %134 : vector<1x32x256xi1>, vector<1x32x256xf32>
    %136 = vector.shape_cast %12 : vector<1x1x256xf32> to vector<1x1x256xf32>
    %137 = vector.broadcast %136 : vector<1x1x256xf32> to vector<1x32x256xf32>
    %138 = vector.shape_cast %9 : vector<1x1x256xf32> to vector<1x1x256xf32>
    %139 = vector.broadcast %138 : vector<1x1x256xf32> to vector<1x32x256xf32>
    %140 = arith.select %130, %137, %139 : vector<1x32x256xi1>, vector<1x32x256xf32>
    %141 = vector.shape_cast %18 : vector<1x1x256xf32> to vector<1x1x256xf32>
    %142 = vector.broadcast %141 : vector<1x1x256xf32> to vector<1x32x256xf32>
    %143 = vector.shape_cast %15 : vector<1x1x256xf32> to vector<1x1x256xf32>
    %144 = vector.broadcast %143 : vector<1x1x256xf32> to vector<1x32x256xf32>
    %145 = arith.select %130, %142, %144 : vector<1x32x256xi1>, vector<1x32x256xf32>
    %146 = vector.shape_cast %24 : vector<1x1x256xf32> to vector<1x1x256xf32>
    %147 = vector.broadcast %146 : vector<1x1x256xf32> to vector<1x32x256xf32>
    %148 = vector.shape_cast %21 : vector<1x1x256xf32> to vector<1x1x256xf32>
    %149 = vector.broadcast %148 : vector<1x1x256xf32> to vector<1x32x256xf32>
    %150 = arith.select %130, %147, %149 : vector<1x32x256xi1>, vector<1x32x256xf32>
    %c1_31 = arith.constant 1 : index
    %c2_32 = arith.constant 2 : index
    %c0_33 = arith.constant 0 : index
    %151 = vector.load %arg3[%c1_31, %c2_32, %c0_33] : memref<3x4x256xi32, #tpu.memory_space<vmem>>, vector<1x1x256xi32>
    %152 = vector.shape_cast %151 : vector<1x1x256xi32> to vector<1x256xi32>
    %153 = vector.shape_cast %152 : vector<1x256xi32> to vector<1x1x256xi32>
    %154 = vector.broadcast %153 : vector<1x1x256xi32> to vector<1x32x256xi32>
    %155 = arith.shli %154, %27 : vector<1x32x256xi32>
    %c0_i32_34 = arith.constant 0 : i32
    %156 = vector.broadcast %c0_i32_34 : i32 to vector<1x32x256xi32>
    %157 = arith.cmpi slt, %155, %156 : vector<1x32x256xi32>
    %158 = arith.select %157, %140, %135 : vector<1x32x256xi1>, vector<1x32x256xf32>
    %159 = arith.select %157, %150, %145 : vector<1x32x256xi1>, vector<1x32x256xf32>
    %c2_35 = arith.constant 2 : index
    %c2_36 = arith.constant 2 : index
    %c0_37 = arith.constant 0 : index
    %160 = vector.load %arg3[%c2_35, %c2_36, %c0_37] : memref<3x4x256xi32, #tpu.memory_space<vmem>>, vector<1x1x256xi32>
    %161 = vector.shape_cast %160 : vector<1x1x256xi32> to vector<1x256xi32>
    %162 = vector.shape_cast %161 : vector<1x256xi32> to vector<1x1x256xi32>
    %163 = vector.broadcast %162 : vector<1x1x256xi32> to vector<1x32x256xi32>
    %164 = arith.shli %163, %27 : vector<1x32x256xi32>
    %c0_i32_38 = arith.constant 0 : i32
    %165 = vector.broadcast %c0_i32_38 : i32 to vector<1x32x256xi32>
    %166 = arith.cmpi slt, %164, %165 : vector<1x32x256xi32>
    %167 = arith.select %166, %159, %158 : vector<1x32x256xi1>, vector<1x32x256xf32>
    %168 = arith.truncf %167 : vector<1x32x256xf32> to vector<1x32x256xbf16>
    %169 = vector.shape_cast %168 : vector<1x32x256xbf16> to vector<32x256xbf16>
    %c64 = arith.constant 64 : index
    %c0_39 = arith.constant 0 : index
    %170 = vector.load %arg7[%c64, %c0_39] : memref<128x256xbf16, #tpu.memory_space<vmem>>, vector<32x256xbf16>
    tpu.vector_store %arg7[%c64, %c0_39], %169 {strides = array<i32>} : memref<128x256xbf16, #tpu.memory_space<vmem>>, vector<32x256xbf16>,
    %c0_40 = arith.constant 0 : index
    %c3 = arith.constant 3 : index
    %c0_41 = arith.constant 0 : index
    %171 = vector.load %arg3[%c0_40, %c3, %c0_41] : memref<3x4x256xi32, #tpu.memory_space<vmem>>, vector<1x1x256xi32>
    %172 = vector.shape_cast %171 : vector<1x1x256xi32> to vector<1x256xi32>
    %173 = vector.shape_cast %172 : vector<1x256xi32> to vector<1x1x256xi32>
    %174 = vector.broadcast %173 : vector<1x1x256xi32> to vector<1x32x256xi32>
    %175 = arith.shli %174, %27 : vector<1x32x256xi32>
    %c0_i32_42 = arith.constant 0 : i32
    %176 = vector.broadcast %c0_i32_42 : i32 to vector<1x32x256xi32>
    %177 = arith.cmpi slt, %175, %176 : vector<1x32x256xi32>
    %178 = vector.shape_cast %6 : vector<1x1x256xf32> to vector<1x1x256xf32>
    %179 = vector.broadcast %178 : vector<1x1x256xf32> to vector<1x32x256xf32>
    %180 = vector.shape_cast %3 : vector<1x1x256xf32> to vector<1x1x256xf32>
    %181 = vector.broadcast %180 : vector<1x1x256xf32> to vector<1x32x256xf32>
    %182 = arith.select %177, %179, %181 : vector<1x32x256xi1>, vector<1x32x256xf32>
    %183 = vector.shape_cast %12 : vector<1x1x256xf32> to vector<1x1x256xf32>
    %184 = vector.broadcast %183 : vector<1x1x256xf32> to vector<1x32x256xf32>
    %185 = vector.shape_cast %9 : vector<1x1x256xf32> to vector<1x1x256xf32>
    %186 = vector.broadcast %185 : vector<1x1x256xf32> to vector<1x32x256xf32>
    %187 = arith.select %177, %184, %186 : vector<1x32x256xi1>, vector<1x32x256xf32>
    %188 = vector.shape_cast %18 : vector<1x1x256xf32> to vector<1x1x256xf32>
    %189 = vector.broadcast %188 : vector<1x1x256xf32> to vector<1x32x256xf32>
    %190 = vector.shape_cast %15 : vector<1x1x256xf32> to vector<1x1x256xf32>
    %191 = vector.broadcast %190 : vector<1x1x256xf32> to vector<1x32x256xf32>
    %192 = arith.select %177, %189, %191 : vector<1x32x256xi1>, vector<1x32x256xf32>
    %193 = vector.shape_cast %24 : vector<1x1x256xf32> to vector<1x1x256xf32>
    %194 = vector.broadcast %193 : vector<1x1x256xf32> to vector<1x32x256xf32>
    %195 = vector.shape_cast %21 : vector<1x1x256xf32> to vector<1x1x256xf32>
    %196 = vector.broadcast %195 : vector<1x1x256xf32> to vector<1x32x256xf32>
    %197 = arith.select %177, %194, %196 : vector<1x32x256xi1>, vector<1x32x256xf32>
    %c1_43 = arith.constant 1 : index
    %c3_44 = arith.constant 3 : index
    %c0_45 = arith.constant 0 : index
    %198 = vector.load %arg3[%c1_43, %c3_44, %c0_45] : memref<3x4x256xi32, #tpu.memory_space<vmem>>, vector<1x1x256xi32>
    %199 = vector.shape_cast %198 : vector<1x1x256xi32> to vector<1x256xi32>
    %200 = vector.shape_cast %199 : vector<1x256xi32> to vector<1x1x256xi32>
    %201 = vector.broadcast %200 : vector<1x1x256xi32> to vector<1x32x256xi32>
    %202 = arith.shli %201, %27 : vector<1x32x256xi32>
    %c0_i32_46 = arith.constant 0 : i32
    %203 = vector.broadcast %c0_i32_46 : i32 to vector<1x32x256xi32>
    %204 = arith.cmpi slt, %202, %203 : vector<1x32x256xi32>
    %205 = arith.select %204, %187, %182 : vector<1x32x256xi1>, vector<1x32x256xf32>
    %206 = arith.select %204, %197, %192 : vector<1x32x256xi1>, vector<1x32x256xf32>
    %c2_47 = arith.constant 2 : index
    %c3_48 = arith.constant 3 : index
    %c0_49 = arith.constant 0 : index
    %207 = vector.load %arg3[%c2_47, %c3_48, %c0_49] : memref<3x4x256xi32, #tpu.memory_space<vmem>>, vector<1x1x256xi32>
    %208 = vector.shape_cast %207 : vector<1x1x256xi32> to vector<1x256xi32>
    %209 = vector.shape_cast %208 : vector<1x256xi32> to vector<1x1x256xi32>
    %210 = vector.broadcast %209 : vector<1x1x256xi32> to vector<1x32x256xi32>
    %211 = arith.shli %210, %27 : vector<1x32x256xi32>
    %c0_i32_50 = arith.constant 0 : i32
    %212 = vector.broadcast %c0_i32_50 : i32 to vector<1x32x256xi32>
    %213 = arith.cmpi slt, %211, %212 : vector<1x32x256xi32>
    %214 = arith.select %213, %206, %205 : vector<1x32x256xi1>, vector<1x32x256xf32>
    %215 = arith.truncf %214 : vector<1x32x256xf32> to vector<1x32x256xbf16>
    %216 = vector.shape_cast %215 : vector<1x32x256xbf16> to vector<32x256xbf16>
    %c96 = arith.constant 96 : index
    %c0_51 = arith.constant 0 : index
    %217 = vector.load %arg7[%c96, %c0_51] : memref<128x256xbf16, #tpu.memory_space<vmem>>, vector<32x256xbf16>
    tpu.vector_store %arg7[%c96, %c0_51], %216 {strides = array<i32>} : memref<128x256xbf16, #tpu.memory_space<vmem>>, vector<32x256xbf16>,
    %c0_52 = arith.constant 0 : index
    %c0_53 = arith.constant 0 : index
    %218 = vector.load %arg2[%c0_52, %c0_53] : memref<16x128xbf16, #tpu.memory_space<vmem>>, vector<16x128xbf16>
    %c0_54 = arith.constant 0 : index
    %c0_55 = arith.constant 0 : index
    %219 = vector.load %arg7[%c0_54, %c0_55] : memref<128x256xbf16, #tpu.memory_space<vmem>>, vector<128x256xbf16>
    %c0_56 = arith.constant 0 : index
    %c0_57 = arith.constant 0 : index
    %220 = vector.load %arg8[%c0_56, %c0_57] : memref<16x256xf32, #tpu.memory_space<vmem>>, vector<16x256xf32>
    %cst_58 = arith.constant dense<0.000000e+00> : vector<16x256xf32>
    %221 = tpu.matmul %218, %219, %cst_58 {dimension_numbers = #tpu.dot_dimension_numbers<[1], [0], [0], [1], [0, 0, 1, 1], [], []>} : vector<16x128xbf16>, vector<128x256xbf16>, vector<16x256xf32> -> vector<16x256xf32>
    %222 = arith.addf %220, %221 : vector<16x256xf32>
    %c0_59 = arith.constant 0 : index
    %c0_60 = arith.constant 0 : index
    %223 = vector.load %arg8[%c0_59, %c0_60] : memref<16x256xf32, #tpu.memory_space<vmem>>, vector<16x256xf32>
    tpu.vector_store %arg8[%c0_59, %c0_60], %222 {strides = array<i32>} : memref<16x256xf32, #tpu.memory_space<vmem>>, vector<16x256xf32>,
    %c0_61 = arith.constant 0 : index
    %c0_62 = arith.constant 0 : index
    %224 = vector.load %arg8[%c0_61, %c0_62] : memref<16x256xf32, #tpu.memory_space<vmem>>, vector<16x256xf32>
    %c0_63 = arith.constant 0 : index
    %c0_64 = arith.constant 0 : index
    %225 = vector.load %arg5[%c0_63, %c0_64] : memref<1x256xf32, #tpu.memory_space<vmem>>, vector<1x256xf32>
    %226 = vector.broadcast %225 : vector<1x256xf32> to vector<16x256xf32>
    %227 = arith.addf %224, %226 : vector<16x256xf32>
    %cst_65 = arith.constant -65176.4805 : f32
    %cst_66 = arith.constant 65176.4805 : f32
    %228 = vector.broadcast %cst_65 : f32 to vector<16x256xf32>
    %229 = arith.maximumf %228, %227 : vector<16x256xf32>
    %230 = vector.broadcast %cst_66 : f32 to vector<16x256xf32>
    %231 = arith.minimumf %230, %229 : vector<16x256xf32>
    %232 = arith.truncf %231 : vector<16x256xf32> to vector<16x256xbf16>
    %c0_67 = arith.constant 0 : index
    %c0_68 = arith.constant 0 : index
    %233 = vector.load %arg6[%c0_67, %c0_68] : memref<16x256xbf16, #tpu.memory_space<vmem>>, vector<16x256xbf16>
    tpu.vector_store %arg6[%c0_67, %c0_68], %232 {strides = array<i32>} : memref<16x256xbf16, #tpu.memory_space<vmem>>, vector<16x256xbf16>,
    return
  }
  func.func @transform_0(%arg0: i32, %arg1: i32) -> (i32, i32) {
    %c0_i32 = arith.constant 0 : i32
    %c0_i32_0 = arith.constant 0 : i32
    return %arg1, %c0_i32 : i32, i32
  }
  func.func @transform_1(%arg0: i32, %arg1: i32) -> (i32, i32, i32) {
    %c0_i32 = arith.constant 0 : i32
    %c0_i32_0 = arith.constant 0 : i32
    %c0_i32_1 = arith.constant 0 : i32
    return %c0_i32, %c0_i32_0, %arg0 : i32, i32, i32
  }
  func.func @transform_2(%arg0: i32, %arg1: i32) -> (i32, i32) {
    %c0_i32 = arith.constant 0 : i32
    %c0_i32_0 = arith.constant 0 : i32
    return %c0_i32, %arg0 : i32, i32
  }
  func.func @transform_3(%arg0: i32, %arg1: i32) -> (i32, i32) {
    %c0_i32 = arith.constant 0 : i32
    %c0_i32_0 = arith.constant 0 : i32
    return %c0_i32, %arg0 : i32, i32
  }
  func.func @transform_4(%arg0: i32, %arg1: i32) -> (i32, i32) {
    %c0_i32 = arith.constant 0 : i32
    return %arg1, %arg0 : i32, i32
  }
}

</mosaic_0001>

<bundles_post_ra>
// kernel: tpu_custom_call.1
= control target key start
LH: loop header
LB: loop body
LE: loop exit
PB: predicated region body
PF: predicated region fallthrough
CT: control target
= control target key end

     0   :  { %9 = vsyncpa [#allocation5], 0  ;;  %s1950_s0 = inlined_call_operand.hbm [shape: bf16[16,128], index: 0, kind: input, shape index: {}]   ;;  %s1951_s1 = inlined_call_operand.hbm [shape: s32[3,4,256], index: 1, kind: input, shape index: {}]   ;;  %s1952_s2 = inlined_call_operand.hbm [shape: f32[8,256], index: 2, kind: input, shape index: {}]   ;;  %s1953_s3 = inlined_call_operand.vmem [shape: f32[1,256], index: 3, kind: input, shape index: {}]   ;;  %s1954_s4 = inlined_call_operand.hbm [shape: bf16[16,256], index: 4, kind: output, shape index: {}]  }
   0x1   :  { %10 = vsyncpa [#allocation8], 0  ;;  %s29_s17 = sshll.u32 %s1951_s1, 4  ;;  %s30_s17 = int_to_ptr.hbm [resolvable:$true] %s29_s17 }
   0x2   :  { %11 = vsyncpa [#allocation6], 0  ;;  %s984_s18 = smov [#allocation7]   ;;  %s16_s22 = sshll.u32 %s1950_s0, 4  ;;  %s17_s22 = int_to_ptr.hbm [resolvable:$true] %s16_s22 }
   0x3   :  { %s31_s19 = sshll.u32 %s984_s18, 4  ;;  %s985_s23 = smov 128   ;;  %s32_s19 = int_to_ptr.vmem [resolvable:$true] %s31_s19 }
   0x4   :  { %s986_s24 = smov 8   ;;  %s987_s25 = smov [#allocation4]  }
   0x5   :  { %37 = dma.hbm_to_vmem [thread:$0]  %s30_s17, 384, %s32_s19, [#allocation8], %s985_s23, %s985_s23, %s986_s24  }
   0x6   :  { %s18_s26 = sshll.u32 %s987_s25, 4  ;;  %s988_s1 = smov 64   ;;  %s19_s26 = int_to_ptr.vmem [resolvable:$true] %s18_s26 }
   0x7   :  { %s989_s27 = smov 4   ;;  %s43_s30 = sshll.u32 %s1952_s2, 4  ;;  %s44_s30 = int_to_ptr.hbm [resolvable:$true] %s43_s30 }
   0x8   :  { %24 = dma.hbm_to_vmem [thread:$0]  %s17_s22, 128, %s19_s26, [#allocation5], %s988_s1, %s988_s1, %s989_s27  }
   0x9   :  { %s990_s5 = smov [#allocation9]  }
   0xa   :  { %s45_s0 = sshll.u32 %s990_s5, 4  ;;  %s46_s0 = int_to_ptr.vmem [resolvable:$true] %s45_s0 }
   0xb   :  { %48 = dma.hbm_to_vmem [thread:$0]  %s44_s30, 256, %s46_s0, [#allocation8]  }
   0xc   :  { %978 = dma.done.wait [#allocation5], 128  }
   0xd   :  { %979 = vsyncadd [#allocation5], 4294967168 }
   0xe   :  { %980 = dma.done.wait [#allocation8], 640  }
   0xf   :  { %981 = vsyncadd [#allocation8], 4294966656  ;;  %v65_v0 = vlaneseq  ;;  %v63_v5 = vld [vmem:[#allocation9] sm:$0xff]  ;;  %v64_v6 = vld [vmem:[#allocation9 + $0x8] sm:$0xff]  ;;  %s991_s7 = smov [#allocation10]  }
  0x10   :  { %v1035_v10 = vperm.slane %v63_v5, 1  ;;  %v466_v11 = vld [vmem:[#allocation7 + $0x3] ss:$4 sm:$0x3]  ;;  %v1039_v13 = vperm.slane %v64_v6, 1  ;;  %v1041_v14 = vperm.slane %v63_v5, 0 }
  0x11   :  { %v66_v1 = vshrl.u32 %v65_v0, 7  ;;  %v1043_v15 = vperm.slane %v64_v6, 0  ;;  %v1045_v16 = vperm.slane %v63_v5, 3  ;;  %v1047_v17 = vperm.slane %v64_v6, 3  ;;  %s763_s8 = sshll.u32 %s991_s7, 4  ;;  %s764_s8 = int_to_ptr.vmem [resolvable:$true] %s763_s8 }
  0x12   :  { %v1049_v18 = vperm.slane %v63_v5, 2  ;;  %v1051_v19 = vperm.slane %v64_v6, 2  ;;  %v1053_v20 = vperm.slane %v63_v5, 5  ;;  %v1055_v21 = vperm.slane %v64_v6, 5 }
  0x13   :  { %v68_v2 = vadd.s32 16, %v66_v1  ;;  %v69_v3 = vadd.s32 24, %v66_v1  ;;  %v67_v4 = vadd.s32 8, %v66_v1  ;;  %v1031_v8 = vsub.s32 31, %v66_v1 }
  0x14   :  { %v1057_v22 = vperm.slane %v63_v5, 4  ;;  %v1059_v23 = vperm.slane %v64_v6, 4  ;;  %v1061_v24 = vperm.slane %v63_v5, 7  ;;  %v1063_v25 = vperm.slane %v64_v6, 7 }
  0x15   :  { %v1029_v7 = vsub.s32 31, %v68_v2  ;;  %v1033_v9 = vsub.s32 31, %v69_v3  ;;  %v1037_v12 = vsub.s32 31, %v67_v4  ;;  %v467_v26 = vperm.slane %v466_v11, 0 }
  0x16   :  { %v468_v27 = vperm.slane %v466_v11, 1  ;;  %v518_v28 = vld [vmem:[#allocation7 + $0xb] ss:$4 sm:$0x3]  ;;  %v1065_v29 = vperm.slane %v63_v5, 6  ;;  %v1067_v30 = vperm.slane %v64_v6, 6 }
  0x17   :  { %v1069_v31 = vperm.slane %v518_v28, 0  ;;  %v1071_v32 = vperm.slane %v518_v28, 1  ;;  %v473_v33 = vshll.u32 %v467_v26, %v1029_v7  ;;  %v475_v35 = vshll.u32 %v467_v26, %v1033_v9  ;;  %v554_v61 = vld [vmem:[#allocation7 + $0x13] ss:$4 sm:$0x3] }
  0x18   :  { %v474_v34 = vshll.u32 %v468_v27, %v1029_v7  ;;  %v476_v36 = vshll.u32 %v468_v27, %v1033_v9  ;;  %v1165_v6 = vperm.slane %v554_v61, 0  ;;  %v1167_v11 = vperm.slane %v554_v61, 1 }
  0x19   :  { %v525_v37 = vshll.u32 %v1069_v31, %v1029_v7  ;;  %v526_v38 = vshll.u32 %v1071_v32, %v1029_v7  ;;  %v527_v39 = vshll.u32 %v1069_v31, %v1033_v9  ;;  %v528_v40 = vshll.u32 %v1071_v32, %v1033_v9 }
  0x1a   :  { %vm1085_vm0 = vcmp.lt.s32.totalorder %v473_v33, 0  ;;  %vm1089_vm1 = vcmp.lt.s32.totalorder %v474_v34, 0  ;;  %vm1093_vm2 = vcmp.lt.s32.totalorder %v475_v35, 0  ;;  %vm1097_vm3 = vcmp.lt.s32.totalorder %v476_v36, 0 }
  0x1b   :  { %v489_v45 = vsel %vm1085_vm0, %v1035_v10, %v1041_v14  ;;  %v490_v46 = vsel %vm1089_vm1, %v1039_v13, %v1043_v15  ;;  %v491_v47 = vsel %vm1093_vm2, %v1035_v10, %v1041_v14  ;;  %v492_v48 = vsel %vm1097_vm3, %v1039_v13, %v1043_v15 }
  0x1c   :  { %v497_v49 = vsel %vm1085_vm0, %v1045_v16, %v1049_v18  ;;  %v498_v50 = vsel %vm1089_vm1, %v1047_v17, %v1051_v19  ;;  %v499_v51 = vsel %vm1093_vm2, %v1045_v16, %v1049_v18  ;;  %v500_v52 = vsel %vm1097_vm3, %v1047_v17, %v1051_v19 }
  0x1d   :  { %v505_v53 = vsel %vm1085_vm0, %v1053_v20, %v1057_v22  ;;  %v506_v54 = vsel %vm1089_vm1, %v1055_v21, %v1059_v23  ;;  %v507_v55 = vsel %vm1093_vm2, %v1053_v20, %v1057_v22  ;;  %v508_v56 = vsel %vm1097_vm3, %v1055_v21, %v1059_v23 }
  0x1e   :  { %v513_v57 = vsel %vm1085_vm0, %v1061_v24, %v1065_v29  ;;  %v514_v58 = vsel %vm1089_vm1, %v1063_v25, %v1067_v30  ;;  %v515_v59 = vsel %vm1093_vm2, %v1061_v24, %v1065_v29  ;;  %v516_v60 = vsel %vm1097_vm3, %v1063_v25, %v1067_v30 }
  0x1f   :  { %vm533_vm4 = vcmp.lt.s32.totalorder %v525_v37, 0  ;;  %vm534_vm5 = vcmp.lt.s32.totalorder %v526_v38, 0  ;;  %vm535_vm6 = vcmp.lt.s32.totalorder %v527_v39, 0  ;;  %vm536_vm7 = vcmp.lt.s32.totalorder %v528_v40, 0 }
  0x20   :  { %v541_v62 = vsel %vm533_vm4, %v497_v49, %v489_v45  ;;  %v542_v63 = vsel %vm534_vm5, %v498_v50, %v490_v46  ;;  %v543_v0 = vsel %vm535_vm6, %v499_v51, %v491_v47  ;;  %v544_v1 = vsel %vm536_vm7, %v500_v52, %v492_v48 }
  0x21   :  { %v549_v2 = vsel %vm533_vm4, %v513_v57, %v505_v53  ;;  %v550_v3 = vsel %vm534_vm5, %v514_v58, %v506_v54  ;;  %v551_v4 = vsel %vm535_vm6, %v515_v59, %v507_v55  ;;  %v552_v5 = vsel %vm536_vm7, %v516_v60, %v508_v56 }
  0x22   :  { %v469_v28 = vshll.u32 %v467_v26, %v1031_v8  ;;  %v470_v33 = vshll.u32 %v468_v27, %v1031_v8  ;;  %v471_v34 = vshll.u32 %v467_v26, %v1037_v12  ;;  %v472_v35 = vshll.u32 %v468_v27, %v1037_v12  ;;  %v430_v27 = vld [vmem:[#allocation7 + $0x12] ss:$4 sm:$0x3] }
  0x23   :  { %v521_v36 = vshll.u32 %v1069_v31, %v1031_v8  ;;  %v522_v37 = vshll.u32 %v1071_v32, %v1031_v8  ;;  %v561_v38 = vshll.u32 %v1165_v6, %v1029_v7  ;;  %v562_v39 = vshll.u32 %v1167_v11, %v1029_v7 }
  0x24   :  { %v563_v40 = vshll.u32 %v1165_v6, %v1033_v9  ;;  %v564_v26 = vshll.u32 %v1167_v11, %v1033_v9  ;;  %vm1185_vm8 = vcmp.lt.s32.totalorder %v469_v28, 0  ;;  %vm1189_vm9 = vcmp.lt.s32.totalorder %v470_v33, 0 }
  0x25   :  { %vm1193_vm10 = vcmp.lt.s32.totalorder %v471_v34, 0  ;;  %vm1197_vm11 = vcmp.lt.s32.totalorder %v472_v35, 0  ;;  %vm569_vm12 = vcmp.lt.s32.totalorder %v561_v38, 0  ;;  %vm570_vm13 = vcmp.lt.s32.totalorder %v562_v39, 0 }
  0x26   :  { %vm571_vm14 = vcmp.lt.s32.totalorder %v563_v40, 0  ;;  %vm572_vm15 = vcmp.lt.s32.totalorder %v564_v26, 0  ;;  %v577_v44 = vsel %vm569_vm12, %v549_v2, %v541_v62  ;;  %v578_v45 = vsel %vm570_vm13, %v550_v3, %v542_v63 }
  0x27   :  { %v579_v46 = vsel %vm571_vm14, %v551_v4, %v543_v0  ;;  %v580_v47 = vsel %vm572_vm15, %v552_v5, %v544_v1  ;;  %v583_v48 = vpack.c.bf16 %v578_v45, %v577_v44  ;;  %v485_v50 = vsel %vm1185_vm8, %v1035_v10, %v1041_v14 }
  0x28   :  { %v584_v49 = vpack.c.bf16 %v580_v47, %v579_v46  ;;  %v486_v51 = vsel %vm1189_vm9, %v1039_v13, %v1043_v15  ;;  %v487_v52 = vsel %vm1193_vm10, %v1035_v10, %v1041_v14  ;;  %v488_v53 = vsel %vm1197_vm11, %v1039_v13, %v1043_v15 }
  0x29   :  { %v493_v54 = vsel %vm1185_vm8, %v1045_v16, %v1049_v18  ;;  %v494_v55 = vsel %vm1189_vm9, %v1047_v17, %v1051_v19  ;;  %587 = vst [vmem:[#allocation2 + $0x70] sm:$0xff] %v583_v48  ;;  %v495_v56 = vsel %vm1193_vm10, %v1045_v16, %v1049_v18  ;;  %v496_v57 = vsel %vm1197_vm11, %v1047_v17, %v1051_v19 }
  0x2a   :  { %v501_v58 = vsel %vm1185_vm8, %v1053_v20, %v1057_v22  ;;  %v502_v59 = vsel %vm1189_vm9, %v1055_v21, %v1059_v23  ;;  %588 = vst [vmem:[#allocation2 + $0x78] sm:$0xff] %v584_v49  ;;  %v503_v60 = vsel %vm1193_vm10, %v1053_v20, %v1057_v22  ;;  %v504_v61 = vsel %vm1197_vm11, %v1055_v21, %v1059_v23 }
  0x2b   :  { %v509_v62 = vsel %vm1185_vm8, %v1061_v24, %v1065_v29  ;;  %v510_v63 = vsel %vm1189_vm9, %v1063_v25, %v1067_v30  ;;  %v511_v0 = vsel %vm1193_vm10, %v1061_v24, %v1065_v29  ;;  %v512_v1 = vsel %vm1197_vm11, %v1063_v25, %v1067_v30 }
  0x2c   :  { %v523_v2 = vshll.u32 %v1069_v31, %v1037_v12  ;;  %v524_v3 = vshll.u32 %v1071_v32, %v1037_v12  ;;  %vm529_vm0 = vcmp.lt.s32.totalorder %v521_v36, 0  ;;  %vm530_vm1 = vcmp.lt.s32.totalorder %v522_v37, 0  ;;  %v342_v31 = vld [vmem:[#allocation7 + $0x2] ss:$4 sm:$0x3] }
  0x2d   :  { %v557_v4 = vshll.u32 %v1165_v6, %v1031_v8  ;;  %v558_v5 = vshll.u32 %v1167_v11, %v1031_v8  ;;  %v537_v28 = vsel %vm529_vm0, %v493_v54, %v485_v50  ;;  %v538_v33 = vsel %vm530_vm1, %v494_v55, %v486_v51  ;;  %v394_v37 = vld [vmem:[#allocation7 + $0xa] ss:$4 sm:$0x3] }
  0x2e   :  { %vm531_vm2 = vcmp.lt.s32.totalorder %v523_v2, 0  ;;  %vm532_vm3 = vcmp.lt.s32.totalorder %v524_v3, 0  ;;  %v545_v38 = vsel %vm529_vm0, %v509_v62, %v501_v58  ;;  %v546_v39 = vsel %vm530_vm1, %v510_v63, %v502_v59 }
  0x2f   :  { %v539_v34 = vsel %vm531_vm2, %v495_v56, %v487_v52  ;;  %v540_v35 = vsel %vm532_vm3, %v496_v57, %v488_v53  ;;  %v547_v40 = vsel %vm531_vm2, %v511_v0, %v503_v60  ;;  %v548_v26 = vsel %vm532_vm3, %v512_v1, %v504_v61 }
  0x30   :  { %v559_v32 = vshll.u32 %v1165_v6, %v1037_v12  ;;  %v560_v36 = vshll.u32 %v1167_v11, %v1037_v12  ;;  %v847_v41 = vld [vmem:[#allocation2 + $0x70] sm:$0xf]  ;;  %v872_v42 = vld [vmem:[#allocation2 + $0x74] sm:$0xf]  ;;  %vm565_vm4 = vcmp.lt.s32.totalorder %v557_v4, 0  ;;  %vm566_vm5 = vcmp.lt.s32.totalorder %v558_v5, 0 }
  0x31   :  { %v873_v43 = vld [vmem:[#allocation2 + $0x74] sm:$0xf0]  ;;  %v849_v44 = vld [vmem:[#allocation2 + $0x78] sm:$0xf0]  ;;  %v573_v45 = vsel %vm565_vm4, %v545_v38, %v537_v28  ;;  %v574_v46 = vsel %vm566_vm5, %v546_v39, %v538_v33  ;;  %v1277_v52 = vperm.slane %v342_v31, 0  ;;  %v1279_v11 = vperm.slane %v342_v31, 1 }
  0x32   :  { %vm567_vm6 = vcmp.lt.s32.totalorder %v559_v32, 0  ;;  %vm568_vm7 = vcmp.lt.s32.totalorder %v560_v36, 0  ;;  %v848_v47 = vor.u32 %v873_v43, %v847_v41  ;;  %v852_v48 = vor.u32 %v872_v42, %v849_v44 }
  0x33   :  { %v575_v49 = vsel %vm567_vm6, %v547_v40, %v539_v34  ;;  %v576_v50 = vsel %vm568_vm7, %v548_v26, %v540_v35  ;;  %v581_v6 = vpack.c.bf16 %v574_v46, %v573_v45  ;;  %v1281_v53 = vperm.slane %v394_v37, 0 }
  0x34   :  { %v582_v51 = vpack.c.bf16 %v576_v50, %v575_v49  ;;  %697 = vmatpush.bf16.msra.mxu0 %v848_v47  ;;  %711 = vmatpush.bf16.msra.mxu1 %v852_v48  ;;  %v1283_v54 = vperm.slane %v394_v37, 1  ;;  %v1285_v55 = vperm.slane %v430_v27, 0  ;;  %v1287_v56 = vperm.slane %v430_v27, 1 }
  0x35   :  { %585 = vst [vmem:[#allocation2 + $0x60] sm:$0xff] %v581_v6  ;;  %v349_v57 = vshll.u32 %v1277_v52, %v1029_v7  ;;  %v350_v58 = vshll.u32 %v1279_v11, %v1029_v7  ;;  %v351_v59 = vshll.u32 %v1277_v52, %v1033_v9  ;;  %v352_v60 = vshll.u32 %v1279_v11, %v1033_v9 }
  0x36   :  { %586 = vst [vmem:[#allocation2 + $0x68] sm:$0xff] %v582_v51  ;;  %v401_v61 = vshll.u32 %v1281_v53, %v1029_v7  ;;  %v402_v62 = vshll.u32 %v1283_v54, %v1029_v7  ;;  %v403_v63 = vshll.u32 %v1281_v53, %v1033_v9  ;;  %v404_v0 = vshll.u32 %v1283_v54, %v1033_v9 }
  0x37   :  { %vm1305_vm8 = vcmp.lt.s32.totalorder %v349_v57, 0  ;;  %vm1309_vm9 = vcmp.lt.s32.totalorder %v350_v58, 0  ;;  %vm1313_vm10 = vcmp.lt.s32.totalorder %v351_v59, 0  ;;  %vm1317_vm11 = vcmp.lt.s32.totalorder %v352_v60, 0 }
  0x38   :  { %v365_v5 = vsel %vm1305_vm8, %v1035_v10, %v1041_v14  ;;  %v366_v28 = vsel %vm1309_vm9, %v1039_v13, %v1043_v15  ;;  %v367_v33 = vsel %vm1313_vm10, %v1035_v10, %v1041_v14  ;;  %v368_v34 = vsel %vm1317_vm11, %v1039_v13, %v1043_v15 }
  0x39   :  { %v373_v35 = vsel %vm1305_vm8, %v1045_v16, %v1049_v18  ;;  %v374_v38 = vsel %vm1309_vm9, %v1047_v17, %v1051_v19  ;;  %v375_v39 = vsel %vm1313_vm10, %v1045_v16, %v1049_v18  ;;  %v376_v31 = vsel %vm1317_vm11, %v1047_v17, %v1051_v19 }
  0x3a   :  { %v381_v40 = vsel %vm1305_vm8, %v1053_v20, %v1057_v22  ;;  %v382_v26 = vsel %vm1309_vm9, %v1055_v21, %v1059_v23  ;;  %v383_v32 = vsel %vm1313_vm10, %v1053_v20, %v1057_v22  ;;  %v384_v36 = vsel %vm1317_vm11, %v1055_v21, %v1059_v23 }
  0x3b   :  { %v389_v37 = vsel %vm1305_vm8, %v1061_v24, %v1065_v29  ;;  %v390_v27 = vsel %vm1309_vm9, %v1063_v25, %v1067_v30  ;;  %v391_v41 = vsel %vm1313_vm10, %v1061_v24, %v1065_v29  ;;  %v392_v42 = vsel %vm1317_vm11, %v1063_v25, %v1067_v30 }
  0x3c   :  { %v839_v43 = vld [vmem:[#allocation2 + $0x60] sm:$0xf]  ;;  %v870_v44 = vld [vmem:[#allocation2 + $0x64] sm:$0xf]  ;;  %vm409_vm12 = vcmp.lt.s32.totalorder %v401_v61, 0  ;;  %vm410_vm13 = vcmp.lt.s32.totalorder %v402_v62, 0  ;;  %v437_v45 = vshll.u32 %v1285_v55, %v1029_v7  ;;  %v438_v46 = vshll.u32 %v1287_v56, %v1029_v7 }
  0x3d   :  { %v871_v47 = vld [vmem:[#allocation2 + $0x64] sm:$0xf0]  ;;  %v841_v48 = vld [vmem:[#allocation2 + $0x68] sm:$0xf0]  ;;  %vm411_vm14 = vcmp.lt.s32.totalorder %v403_v63, 0  ;;  %vm412_vm15 = vcmp.lt.s32.totalorder %v404_v0, 0  ;;  %v417_v49 = vsel %vm409_vm12, %v373_v35, %v365_v5  ;;  %v418_v50 = vsel %vm410_vm13, %v374_v38, %v366_v28 }
  0x3e   :  { %v840_v6 = vor.u32 %v871_v47, %v839_v43  ;;  %v844_v51 = vor.u32 %v870_v44, %v841_v48  ;;  %v419_v57 = vsel %vm411_vm14, %v375_v39, %v367_v33  ;;  %v420_v58 = vsel %vm412_vm15, %v376_v31, %v368_v34  ;;  %v270_v31 = vld [vmem:[#allocation7 + $0x9] ss:$4 sm:$0x3] }
  0x3f   :  { %v425_v59 = vsel %vm409_vm12, %v389_v37, %v381_v40  ;;  %v426_v60 = vsel %vm410_vm13, %v390_v27, %v382_v26  ;;  %v427_v61 = vsel %vm411_vm14, %v391_v41, %v383_v32  ;;  %v428_v62 = vsel %vm412_vm15, %v392_v42, %v384_v36 }
  0x40   :  { %698 = vmatpush.bf16.msra.mxu0 %v840_v6  ;;  %712 = vmatpush.bf16.msra.mxu1 %v844_v51  ;;  %v439_v1 = vshll.u32 %v1285_v55, %v1033_v9  ;;  %v440_v2 = vshll.u32 %v1287_v56, %v1033_v9  ;;  %vm445_vm0 = vcmp.lt.s32.totalorder %v437_v45, 0  ;;  %vm446_vm1 = vcmp.lt.s32.totalorder %v438_v46, 0 }
  0x41   :  { %v453_v63 = vsel %vm445_vm0, %v425_v59, %v417_v49  ;;  %v454_v0 = vsel %vm446_vm1, %v426_v60, %v418_v50  ;;  %v345_v3 = vshll.u32 %v1277_v52, %v1031_v8  ;;  %v346_v4 = vshll.u32 %v1279_v11, %v1031_v8 }
  0x42   :  { %vm447_vm2 = vcmp.lt.s32.totalorder %v439_v1, 0  ;;  %vm448_vm3 = vcmp.lt.s32.totalorder %v440_v2, 0  ;;  %v459_v5 = vpack.c.bf16 %v454_v0, %v453_v63  ;;  %v347_v28 = vshll.u32 %v1277_v52, %v1037_v12  ;;  %v218_v63 = vld [vmem:[#allocation7 + $0x1] ss:$4 sm:$0x3] }
  0x43   :  { %v455_v33 = vsel %vm447_vm2, %v427_v61, %v419_v57  ;;  %v456_v34 = vsel %vm448_vm3, %v428_v62, %v420_v58  ;;  %v348_v35 = vshll.u32 %v1279_v11, %v1037_v12  ;;  %vm1401_vm4 = vcmp.lt.s32.totalorder %v345_v3, 0 }
  0x44   :  { %v460_v39 = vpack.c.bf16 %v456_v34, %v455_v33  ;;  %463 = vst [vmem:[#allocation2 + $0x50] sm:$0xff] %v459_v5  ;;  %vm1405_vm5 = vcmp.lt.s32.totalorder %v346_v4, 0  ;;  %vm1409_vm6 = vcmp.lt.s32.totalorder %v347_v28, 0  ;;  %v361_v11 = vsel %vm1401_vm4, %v1035_v10, %v1041_v14 }
  0x45   :  { %vm1413_vm7 = vcmp.lt.s32.totalorder %v348_v35, 0  ;;  %v362_v26 = vsel %vm1405_vm5, %v1039_v13, %v1043_v15  ;;  %v363_v32 = vsel %vm1409_vm6, %v1035_v10, %v1041_v14  ;;  %v369_v37 = vsel %vm1401_vm4, %v1045_v16, %v1049_v18 }
  0x46   :  { %464 = vst [vmem:[#allocation2 + $0x58] sm:$0xff] %v460_v39  ;;  %v364_v36 = vsel %vm1413_vm7, %v1039_v13, %v1043_v15  ;;  %v370_v27 = vsel %vm1405_vm5, %v1047_v17, %v1051_v19  ;;  %v371_v41 = vsel %vm1409_vm6, %v1045_v16, %v1049_v18  ;;  %v372_v42 = vsel %vm1413_vm7, %v1047_v17, %v1051_v19 }
  0x47   :  { %v377_v43 = vsel %vm1401_vm4, %v1053_v20, %v1057_v22  ;;  %v378_v44 = vsel %vm1405_vm5, %v1055_v21, %v1059_v23  ;;  %v379_v45 = vsel %vm1409_vm6, %v1053_v20, %v1057_v22  ;;  %v380_v46 = vsel %vm1413_vm7, %v1055_v21, %v1059_v23 }
  0x48   :  { %v385_v47 = vsel %vm1401_vm4, %v1061_v24, %v1065_v29  ;;  %v386_v48 = vsel %vm1405_vm5, %v1063_v25, %v1067_v30  ;;  %v397_v49 = vshll.u32 %v1281_v53, %v1031_v8  ;;  %v398_v50 = vshll.u32 %v1283_v54, %v1031_v8 }
  0x49   :  { %v399_v6 = vshll.u32 %v1281_v53, %v1037_v12  ;;  %v400_v51 = vshll.u32 %v1283_v54, %v1037_v12  ;;  %v387_v57 = vsel %vm1409_vm6, %v1061_v24, %v1065_v29  ;;  %v388_v58 = vsel %vm1413_vm7, %v1063_v25, %v1067_v30 }
  0x4a   :  { %v433_v59 = vshll.u32 %v1285_v55, %v1031_v8  ;;  %v434_v60 = vshll.u32 %v1287_v56, %v1031_v8  ;;  %vm405_vm8 = vcmp.lt.s32.totalorder %v397_v49, 0  ;;  %vm406_vm9 = vcmp.lt.s32.totalorder %v398_v50, 0 }
  0x4b   :  { %v831_v53 = vld [vmem:[#allocation2 + $0x50] sm:$0xf]  ;;  %v868_v61 = vld [vmem:[#allocation2 + $0x54] sm:$0xf]  ;;  %v435_v54 = vshll.u32 %v1285_v55, %v1037_v12  ;;  %v436_v62 = vshll.u32 %v1287_v56, %v1037_v12  ;;  %vm407_vm10 = vcmp.lt.s32.totalorder %v399_v6, 0  ;;  %vm408_vm11 = vcmp.lt.s32.totalorder %v400_v51, 0 }
  0x4c   :  { %v413_v1 = vsel %vm405_vm8, %v369_v37, %v361_v11  ;;  %v414_v2 = vsel %vm406_vm9, %v370_v27, %v362_v26  ;;  %v415_v4 = vsel %vm407_vm10, %v371_v41, %v363_v32  ;;  %v416_v5 = vsel %vm408_vm11, %v372_v42, %v364_v36 }
  0x4d   :  { %v869_v0 = vld [vmem:[#allocation2 + $0x54] sm:$0xf0]  ;;  %v833_v3 = vld [vmem:[#allocation2 + $0x58] sm:$0xf0]  ;;  %v421_v28 = vsel %vm405_vm8, %v385_v47, %v377_v43  ;;  %v422_v33 = vsel %vm406_vm9, %v386_v48, %v378_v44  ;;  %v423_v38 = vsel %vm407_vm10, %v387_v57, %v379_v45  ;;  %v424_v39 = vsel %vm408_vm11, %v388_v58, %v380_v46 }
  0x4e   :  { %v832_v34 = vor.u32 %v869_v0, %v831_v53  ;;  %v836_v35 = vor.u32 %v868_v61, %v833_v3  ;;  %vm441_vm12 = vcmp.lt.s32.totalorder %v433_v59, 0  ;;  %vm442_vm13 = vcmp.lt.s32.totalorder %v434_v60, 0 }
  0x4f   :  { %vm443_vm14 = vcmp.lt.s32.totalorder %v435_v54, 0  ;;  %vm444_vm15 = vcmp.lt.s32.totalorder %v436_v62, 0  ;;  %v449_v55 = vsel %vm441_vm12, %v421_v28, %v413_v1  ;;  %v450_v56 = vsel %vm442_vm13, %v422_v33, %v414_v2 }
  0x50   :  { %699 = vmatpush.bf16.msra.mxu0 %v832_v34  ;;  %713 = vmatpush.bf16.msra.mxu1 %v836_v35  ;;  %v451_v40 = vsel %vm443_vm14, %v423_v38, %v415_v4  ;;  %v1497_v52 = vperm.slane %v218_v63, 0  ;;  %v452_v11 = vsel %vm444_vm15, %v424_v39, %v416_v5  ;;  %v457_v26 = vpack.c.bf16 %v450_v56, %v449_v55  ;;  %v306_v5 = vld [vmem:[#allocation7 + $0x11] ss:$4 sm:$0x3] }
  0x51   :  { %v1499_v32 = vperm.slane %v218_v63, 1  ;;  %v1501_v36 = vperm.slane %v270_v31, 0  ;;  %v458_v37 = vpack.c.bf16 %v452_v11, %v451_v40  ;;  %v1507_v42 = vperm.slane %v270_v31, 1  ;;  %v1601_v34 = vld [vmem:[#allocation7] ss:$4 sm:$0x3] }
  0x52   :  { %v225_v27 = vshll.u32 %v1497_v52, %v1029_v7  ;;  %v227_v41 = vshll.u32 %v1497_v52, %v1033_v9  ;;  %461 = vst [vmem:[#allocation2 + $0x40] sm:$0xff] %v457_v26  ;;  %v1605_v47 = vperm.slane %v306_v5, 1  ;;  %v1618_v51 = vperm.slane %v1601_v34, 0 }
  0x53   :  { %v226_v43 = vshll.u32 %v1499_v32, %v1029_v7  ;;  %v228_v44 = vshll.u32 %v1499_v32, %v1033_v9  ;;  %v277_v45 = vshll.u32 %v1501_v36, %v1029_v7  ;;  %v279_v46 = vshll.u32 %v1501_v36, %v1033_v9  ;;  %462 = vst [vmem:[#allocation2 + $0x48] sm:$0xff] %v458_v37 }
  0x54   :  { %vm1517_vm0 = vcmp.lt.s32.totalorder %v225_v27, 0  ;;  %vm1521_vm1 = vcmp.lt.s32.totalorder %v227_v41, 0  ;;  %v278_v49 = vshll.u32 %v1507_v42, %v1029_v7  ;;  %v280_v50 = vshll.u32 %v1507_v42, %v1033_v9 }
  0x55   :  { %vm1529_vm2 = vcmp.lt.s32.totalorder %v226_v43, 0  ;;  %vm1533_vm3 = vcmp.lt.s32.totalorder %v228_v44, 0  ;;  %v241_v57 = vsel %vm1517_vm0, %v1035_v10, %v1041_v14  ;;  %v243_v58 = vsel %vm1521_vm1, %v1035_v10, %v1041_v14 }
  0x56   :  { %v242_v59 = vsel %vm1529_vm2, %v1039_v13, %v1043_v15  ;;  %v244_v60 = vsel %vm1533_vm3, %v1039_v13, %v1043_v15  ;;  %v249_v53 = vsel %vm1517_vm0, %v1045_v16, %v1049_v18  ;;  %v250_v61 = vsel %vm1529_vm2, %v1047_v17, %v1051_v19 }
  0x57   :  { %v251_v54 = vsel %vm1521_vm1, %v1045_v16, %v1049_v18  ;;  %v252_v62 = vsel %vm1533_vm3, %v1047_v17, %v1051_v19  ;;  %v257_v1 = vsel %vm1517_vm0, %v1053_v20, %v1057_v22  ;;  %v258_v2 = vsel %vm1529_vm2, %v1055_v21, %v1059_v23 }
  0x58   :  { %v259_v63 = vsel %vm1521_vm1, %v1053_v20, %v1057_v22  ;;  %v260_v0 = vsel %vm1533_vm3, %v1055_v21, %v1059_v23  ;;  %v265_v3 = vsel %vm1517_vm0, %v1061_v24, %v1065_v29  ;;  %v266_v4 = vsel %vm1529_vm2, %v1063_v25, %v1067_v30 }
  0x59   :  { %v267_v28 = vsel %vm1521_vm1, %v1061_v24, %v1065_v29  ;;  %v268_v33 = vsel %vm1533_vm3, %v1063_v25, %v1067_v30  ;;  %vm285_vm4 = vcmp.lt.s32.totalorder %v277_v45, 0  ;;  %vm286_vm5 = vcmp.lt.s32.totalorder %v278_v49, 0  ;;  %v823_v35 = vld [vmem:[#allocation2 + $0x40] sm:$0xf]  ;;  %v866_v38 = vld [vmem:[#allocation2 + $0x44] sm:$0xf] }
  0x5a   :  { %vm287_vm6 = vcmp.lt.s32.totalorder %v279_v46, 0  ;;  %vm288_vm7 = vcmp.lt.s32.totalorder %v280_v50, 0  ;;  %v293_v39 = vsel %vm285_vm4, %v249_v53, %v241_v57  ;;  %v294_v31 = vsel %vm286_vm5, %v250_v61, %v242_v59  ;;  %v867_v55 = vld [vmem:[#allocation2 + $0x44] sm:$0xf0]  ;;  %v825_v56 = vld [vmem:[#allocation2 + $0x48] sm:$0xf0] }
  0x5b   :  { %v295_v40 = vsel %vm287_vm6, %v251_v54, %v243_v58  ;;  %v296_v11 = vsel %vm288_vm7, %v252_v62, %v244_v60  ;;  %v301_v26 = vsel %vm285_vm4, %v265_v3, %v257_v1  ;;  %v302_v37 = vsel %vm286_vm5, %v266_v4, %v258_v2 }
  0x5c   :  { %v824_v27 = vor.u32 %v867_v55, %v823_v35  ;;  %v828_v41 = vor.u32 %v866_v38, %v825_v56  ;;  %v303_v43 = vsel %vm287_vm6, %v267_v28, %v259_v63  ;;  %v304_v44 = vsel %vm288_vm7, %v268_v33, %v260_v0 }
  0x5d   :  { %v1603_v45 = vperm.slane %v306_v5, 0  ;;  %v221_v46 = vshll.u32 %v1497_v52, %v1031_v8  ;;  %v222_v48 = vshll.u32 %v1499_v32, %v1031_v8  ;;  %v223_v49 = vshll.u32 %v1497_v52, %v1037_v12 }
  0x5e   :  { %700 = vmatpush.bf16.msra.mxu0 %v824_v27  ;;  %714 = vmatpush.bf16.msra.mxu1 %v828_v41  ;;  %v224_v50 = vshll.u32 %v1499_v32, %v1037_v12  ;;  %v273_v6 = vshll.u32 %v1501_v36, %v1031_v8  ;;  %v314_v58 = vshll.u32 %v1605_v47, %v1029_v7 }
  0x5f   :  { %v313_v57 = vshll.u32 %v1603_v45, %v1029_v7  ;;  %v315_v59 = vshll.u32 %v1603_v45, %v1033_v9  ;;  %v316_v52 = vshll.u32 %v1605_v47, %v1033_v9  ;;  %vm1628_vm8 = vcmp.lt.s32.totalorder %v221_v46, 0 }
  0x60   :  { %vm1632_vm9 = vcmp.lt.s32.totalorder %v222_v48, 0  ;;  %vm1636_vm10 = vcmp.lt.s32.totalorder %v223_v49, 0  ;;  %vm1640_vm11 = vcmp.lt.s32.totalorder %v224_v50, 0  ;;  %vm322_vm13 = vcmp.lt.s32.totalorder %v314_v58, 0 }
  0x61   :  { %vm321_vm12 = vcmp.lt.s32.totalorder %v313_v57, 0  ;;  %vm323_vm14 = vcmp.lt.s32.totalorder %v315_v59, 0  ;;  %vm324_vm15 = vcmp.lt.s32.totalorder %v316_v52, 0  ;;  %v330_v62 = vsel %vm322_vm13, %v302_v37, %v294_v31 }
  0x62   :  { %v329_v54 = vsel %vm321_vm12, %v301_v26, %v293_v39  ;;  %v331_v1 = vsel %vm323_vm14, %v303_v43, %v295_v40  ;;  %v332_v2 = vsel %vm324_vm15, %v304_v44, %v296_v11  ;;  %v237_v3 = vsel %vm1628_vm8, %v1035_v10, %v1041_v14 }
  0x63   :  { %v335_v63 = vpack.c.bf16 %v330_v62, %v329_v54  ;;  %v336_v0 = vpack.c.bf16 %v332_v2, %v331_v1  ;;  %v238_v4 = vsel %vm1632_vm9, %v1039_v13, %v1043_v15  ;;  %v239_v5 = vsel %vm1636_vm10, %v1035_v10, %v1041_v14 }
  0x64   :  { %v240_v28 = vsel %vm1640_vm11, %v1039_v13, %v1043_v15  ;;  %v245_v33 = vsel %vm1628_vm8, %v1045_v16, %v1049_v18  ;;  %v246_v35 = vsel %vm1632_vm9, %v1047_v17, %v1051_v19  ;;  %v247_v38 = vsel %vm1636_vm10, %v1045_v16, %v1049_v18 }
  0x65   :  { %339 = vst [vmem:[#allocation2 + $0x30] sm:$0xff] %v335_v63  ;;  %v248_v39 = vsel %vm1640_vm11, %v1047_v17, %v1051_v19  ;;  %v253_v31 = vsel %vm1628_vm8, %v1053_v20, %v1057_v22  ;;  %v254_v55 = vsel %vm1632_vm9, %v1055_v21, %v1059_v23  ;;  %v255_v56 = vsel %vm1636_vm10, %v1053_v20, %v1057_v22 }
  0x66   :  { %340 = vst [vmem:[#allocation2 + $0x38] sm:$0xff] %v336_v0  ;;  %v256_v40 = vsel %vm1640_vm11, %v1055_v21, %v1059_v23  ;;  %v261_v11 = vsel %vm1628_vm8, %v1061_v24, %v1065_v29  ;;  %v262_v26 = vsel %vm1632_vm9, %v1063_v25, %v1067_v30  ;;  %v263_v37 = vsel %vm1636_vm10, %v1061_v24, %v1065_v29 }
  0x67   :  { %v264_v27 = vsel %vm1640_vm11, %v1063_v25, %v1067_v30  ;;  %v274_v41 = vshll.u32 %v1507_v42, %v1031_v8  ;;  %v275_v43 = vshll.u32 %v1501_v36, %v1037_v12  ;;  %v276_v44 = vshll.u32 %v1507_v42, %v1037_v12 }
  0x68   :  { %vm281_vm0 = vcmp.lt.s32.totalorder %v273_v6, 0  ;;  %v309_v46 = vshll.u32 %v1603_v45, %v1031_v8  ;;  %v310_v48 = vshll.u32 %v1605_v47, %v1031_v8  ;;  %v311_v42 = vshll.u32 %v1603_v45, %v1037_v12  ;;  %v146_v6 = vld [vmem:[#allocation7 + $0x8] ss:$4 sm:$0x3] }
  0x69   :  { %vm282_vm1 = vcmp.lt.s32.totalorder %v274_v41, 0  ;;  %vm283_vm2 = vcmp.lt.s32.totalorder %v275_v43, 0  ;;  %v289_v49 = vsel %vm281_vm0, %v245_v33, %v237_v3  ;;  %v297_v50 = vsel %vm281_vm0, %v261_v11, %v253_v31 }
  0x6a   :  { %vm284_vm3 = vcmp.lt.s32.totalorder %v276_v44, 0  ;;  %v290_v57 = vsel %vm282_vm1, %v246_v35, %v238_v4  ;;  %v291_v58 = vsel %vm283_vm2, %v247_v38, %v239_v5  ;;  %v298_v59 = vsel %vm282_vm1, %v262_v26, %v254_v55 }
  0x6b   :  { %v292_v52 = vsel %vm284_vm3, %v248_v39, %v240_v28  ;;  %v299_v36 = vsel %vm283_vm2, %v263_v37, %v255_v56  ;;  %v300_v32 = vsel %vm284_vm3, %v264_v27, %v256_v40  ;;  %v312_v61 = vshll.u32 %v1605_v47, %v1037_v12 }
  0x6c   :  { %v815_v60 = vld [vmem:[#allocation2 + $0x30] sm:$0xf]  ;;  %v864_v53 = vld [vmem:[#allocation2 + $0x34] sm:$0xf]  ;;  %vm317_vm4 = vcmp.lt.s32.totalorder %v309_v46, 0  ;;  %vm318_vm5 = vcmp.lt.s32.totalorder %v310_v48, 0  ;;  %v85_v54 = vshll.u32 %v1618_v51, %v1029_v7  ;;  %v87_v33 = vshll.u32 %v1618_v51, %v1033_v9 }
  0x6d   :  { %v865_v62 = vld [vmem:[#allocation2 + $0x34] sm:$0xf0]  ;;  %v817_v1 = vld [vmem:[#allocation2 + $0x38] sm:$0xf0]  ;;  %vm319_vm6 = vcmp.lt.s32.totalorder %v311_v42, 0  ;;  %v325_v2 = vsel %vm317_vm4, %v297_v50, %v289_v49  ;;  %v326_v63 = vsel %vm318_vm5, %v298_v59, %v290_v57  ;;  %v1725_v0 = vperm.slane %v1601_v34, 1 }
  0x6e   :  { %v816_v45 = vor.u32 %v865_v62, %v815_v60  ;;  %v820_v3 = vor.u32 %v864_v53, %v817_v1  ;;  %vm320_vm7 = vcmp.lt.s32.totalorder %v312_v61, 0  ;;  %v327_v4 = vsel %vm319_vm6, %v299_v36, %v291_v58  ;;  %v182_v48 = vld [vmem:[#allocation7 + $0x10] ss:$4 sm:$0x3] }
  0x6f   :  { %v328_v5 = vsel %vm320_vm7, %v300_v32, %v292_v52  ;;  %v333_v28 = vpack.c.bf16 %v326_v63, %v325_v2  ;;  %v86_v47 = vshll.u32 %v1725_v0, %v1029_v7  ;;  %v88_v38 = vshll.u32 %v1725_v0, %v1033_v9 }
  0x70   :  { %701 = vmatpush.bf16.msra.mxu0 %v816_v45  ;;  %715 = vmatpush.bf16.msra.mxu1 %v820_v3  ;;  %v334_v35 = vpack.c.bf16 %v328_v5, %v327_v4  ;;  %vm1733_vm8 = vcmp.lt.s32.totalorder %v85_v54, 0  ;;  %v1737_v39 = vperm.slane %v146_v6, 0  ;;  %vm1743_vm10 = vcmp.lt.s32.totalorder %v87_v33, 0 }
  0x71   :  { %337 = vst [vmem:[#allocation2 + $0x20] sm:$0xff] %v333_v28  ;;  %vm1739_vm9 = vcmp.lt.s32.totalorder %v86_v47, 0  ;;  %v105_v56 = vsel %vm1733_vm8, %v1035_v10, %v1041_v14  ;;  %v117_v40 = vsel %vm1733_vm8, %v1045_v16, %v1049_v18  ;;  %vm1755_vm11 = vcmp.lt.s32.totalorder %v88_v38, 0 }
  0x72   :  { %338 = vst [vmem:[#allocation2 + $0x28] sm:$0xff] %v334_v35  ;;  %v106_v26 = vsel %vm1739_vm9, %v1039_v13, %v1043_v15  ;;  %v107_v37 = vsel %vm1743_vm10, %v1035_v10, %v1041_v14  ;;  %v118_v27 = vsel %vm1739_vm9, %v1047_v17, %v1051_v19  ;;  %v108_v41 = vsel %vm1755_vm11, %v1039_v13, %v1043_v15 }
  0x73   :  { %v119_v43 = vsel %vm1743_vm10, %v1045_v16, %v1049_v18  ;;  %v120_v44 = vsel %vm1755_vm11, %v1047_v17, %v1051_v19  ;;  %v129_v46 = vsel %vm1733_vm8, %v1053_v20, %v1057_v22  ;;  %v130_v49 = vsel %vm1739_vm9, %v1055_v21, %v1059_v23 }
  0x74   :  { %v131_v50 = vsel %vm1743_vm10, %v1053_v20, %v1057_v22  ;;  %v132_v57 = vsel %vm1755_vm11, %v1055_v21, %v1059_v23  ;;  %v141_v58 = vsel %vm1733_vm8, %v1061_v24, %v1065_v29  ;;  %v142_v59 = vsel %vm1739_vm9, %v1063_v25, %v1067_v30 }
  0x75   :  { %v143_v52 = vsel %vm1743_vm10, %v1061_v24, %v1065_v29  ;;  %v144_v36 = vsel %vm1755_vm11, %v1063_v25, %v1067_v30  ;;  %v1815_v32 = vperm.slane %v146_v6, 1  ;;  %v153_v42 = vshll.u32 %v1737_v39, %v1029_v7 }
  0x76   :  { %v155_v60 = vshll.u32 %v1737_v39, %v1033_v9  ;;  %v1821_v53 = vperm.slane %v182_v48, 0  ;;  %v1823_v61 = vperm.slane %v182_v48, 1  ;;  %v81_v6 = vshll.u32 %v1618_v51, %v1031_v8 }
  0x77   :  { %v154_v54 = vshll.u32 %v1815_v32, %v1029_v7  ;;  %v156_v62 = vshll.u32 %v1815_v32, %v1033_v9  ;;  %v82_v1 = vshll.u32 %v1725_v0, %v1031_v8  ;;  %vm161_vm12 = vcmp.lt.s32.totalorder %v153_v42, 0 }
  0x78   :  { %v807_v2 = vld [vmem:[#allocation2 + $0x20] sm:$0xf]  ;;  %v862_v63 = vld [vmem:[#allocation2 + $0x24] sm:$0xf]  ;;  %vm163_vm13 = vcmp.lt.s32.totalorder %v155_v60, 0  ;;  %v189_v45 = vshll.u32 %v1821_v53, %v1029_v7  ;;  %v190_v3 = vshll.u32 %v1823_v61, %v1029_v7  ;;  %v169_v28 = vsel %vm161_vm12, %v117_v40, %v105_v56 }
  0x79   :  { %v863_v4 = vld [vmem:[#allocation2 + $0x24] sm:$0xf0]  ;;  %v809_v5 = vld [vmem:[#allocation2 + $0x28] sm:$0xf0]  ;;  %vm162_vm14 = vcmp.lt.s32.totalorder %v154_v54, 0  ;;  %vm164_vm15 = vcmp.lt.s32.totalorder %v156_v62, 0  ;;  %v171_v47 = vsel %vm163_vm13, %v119_v43, %v107_v37  ;;  %v177_v31 = vsel %vm161_vm12, %v141_v58, %v129_v46 }
  0x7a   :  { %v808_v33 = vor.u32 %v863_v4, %v807_v2  ;;  %v812_v35 = vor.u32 %v862_v63, %v809_v5  ;;  %v170_v38 = vsel %vm162_vm14, %v118_v27, %v106_v26  ;;  %v172_v34 = vsel %vm164_vm15, %v120_v44, %v108_v41 }
  0x7b   :  { %v178_v55 = vsel %vm162_vm14, %v142_v59, %v130_v49  ;;  %v179_v11 = vsel %vm163_vm13, %v143_v52, %v131_v50  ;;  %v180_v48 = vsel %vm164_vm15, %v144_v36, %v132_v57  ;;  %v191_v42 = vshll.u32 %v1821_v53, %v1033_v9 }
  0x7c   :  { %702 = vmatpush.bf16.msra.mxu0 %v808_v33  ;;  %716 = vmatpush.bf16.msra.mxu1 %v812_v35  ;;  %v192_v7 = vshll.u32 %v1823_v61, %v1033_v9  ;;  %vm197_vm0 = vcmp.lt.s32.totalorder %v189_v45, 0  ;;  %vm198_vm1 = vcmp.lt.s32.totalorder %v190_v3, 0  ;;  %v83_v26 = vshll.u32 %v1618_v51, %v1037_v12 }
  0x7d   :  { %v205_v56 = vsel %vm197_vm0, %v177_v31, %v169_v28  ;;  %v206_v40 = vsel %vm198_vm1, %v178_v55, %v170_v38  ;;  %v84_v37 = vshll.u32 %v1725_v0, %v1037_v12  ;;  %vm199_vm2 = vcmp.lt.s32.totalorder %v191_v42, 0  ;;  %v857_v42 = vld [vmem:[#allocation4] sm:$0xff] }
  0x7e   :  { %vm200_vm3 = vcmp.lt.s32.totalorder %v192_v7, 0  ;;  %v211_v27 = vpack.c.bf16 %v206_v40, %v205_v56  ;;  %vm1845_vm4 = vcmp.lt.s32.totalorder %v81_v6, 0  ;;  %v207_v43 = vsel %vm199_vm2, %v179_v11, %v171_v47  ;;  %v737_v7 = vld [vmem:[%s1953_s3] sm:$0x3]  ;;  %s765_s3 = sshll.u32 %s1954_s4, 4  ;;  %s766_s3 = int_to_ptr.hbm [resolvable:$true] %s765_s3 }
  0x7f   :  { %v208_v44 = vsel %vm200_vm3, %v180_v48, %v172_v34  ;;  %vm1849_vm5 = vcmp.lt.s32.totalorder %v82_v1, 0  ;;  %vm1853_vm6 = vcmp.lt.s32.totalorder %v83_v26, 0  ;;  %vm1857_vm7 = vcmp.lt.s32.totalorder %v84_v37, 0 }
  0x80   :  { %v212_v51 = vpack.c.bf16 %v208_v44, %v207_v43  ;;  %215 = vst [vmem:[#allocation2 + $0x10] sm:$0xff] %v211_v27  ;;  %v101_v49 = vsel %vm1845_vm4, %v1035_v10, %v1041_v14  ;;  %v102_v50 = vsel %vm1849_vm5, %v1039_v13, %v1043_v15  ;;  %v103_v57 = vsel %vm1853_vm6, %v1035_v10, %v1041_v14 }
  0x81   :  { %v104_v58 = vsel %vm1857_vm7, %v1039_v13, %v1043_v15  ;;  %v113_v59 = vsel %vm1845_vm4, %v1045_v16, %v1049_v18  ;;  %v114_v52 = vsel %vm1849_vm5, %v1047_v17, %v1051_v19  ;;  %v115_v10 = vsel %vm1853_vm6, %v1045_v16, %v1049_v18 }
  0x82   :  { %216 = vst [vmem:[#allocation2 + $0x18] sm:$0xff] %v212_v51  ;;  %v116_v13 = vsel %vm1857_vm7, %v1047_v17, %v1051_v19  ;;  %v125_v14 = vsel %vm1845_vm4, %v1053_v20, %v1057_v22  ;;  %v126_v15 = vsel %vm1849_vm5, %v1055_v21, %v1059_v23  ;;  %v127_v16 = vsel %vm1853_vm6, %v1053_v20, %v1057_v22 }
  0x83   :  { %v128_v17 = vsel %vm1857_vm7, %v1055_v21, %v1059_v23  ;;  %v137_v18 = vsel %vm1845_vm4, %v1061_v24, %v1065_v29  ;;  %v138_v19 = vsel %vm1849_vm5, %v1063_v25, %v1067_v30  ;;  %v139_v20 = vsel %vm1853_vm6, %v1061_v24, %v1065_v29 }
  0x84   :  { %v140_v21 = vsel %vm1857_vm7, %v1063_v25, %v1067_v30  ;;  %v149_v22 = vshll.u32 %v1737_v39, %v1031_v8  ;;  %v150_v23 = vshll.u32 %v1815_v32, %v1031_v8  ;;  %v151_v36 = vshll.u32 %v1737_v39, %v1037_v12 }
  0x85   :  { %v152_v60 = vshll.u32 %v1815_v32, %v1037_v12  ;;  %v185_v24 = vshll.u32 %v1821_v53, %v1031_v8  ;;  %v186_v29 = vshll.u32 %v1823_v61, %v1031_v8  ;;  %v187_v25 = vshll.u32 %v1821_v53, %v1037_v12 }
  0x86   :  { %vm157_vm8 = vcmp.lt.s32.totalorder %v149_v22, 0  ;;  %vm158_vm9 = vcmp.lt.s32.totalorder %v150_v23, 0  ;;  %v188_v30 = vshll.u32 %v1823_v61, %v1037_v12  ;;  %vm159_vm10 = vcmp.lt.s32.totalorder %v151_v36, 0 }
  0x87   :  { %v799_v54 = vld [vmem:[#allocation2 + $0x10] sm:$0xf]  ;;  %v860_v62 = vld [vmem:[#allocation2 + $0x14] sm:$0xf]  ;;  %vm160_vm11 = vcmp.lt.s32.totalorder %v152_v60, 0  ;;  %v165_v39 = vsel %vm157_vm8, %v113_v59, %v101_v49  ;;  %v166_v32 = vsel %vm158_vm9, %v114_v52, %v102_v50  ;;  %v167_v6 = vsel %vm159_vm10, %v115_v10, %v103_v57 }
  0x88   :  { %v168_v1 = vsel %vm160_vm11, %v116_v13, %v104_v58  ;;  %v173_v2 = vsel %vm157_vm8, %v137_v18, %v125_v14  ;;  %v174_v63 = vsel %vm158_vm9, %v138_v19, %v126_v15  ;;  %v175_v3 = vsel %vm159_vm10, %v139_v20, %v127_v16 }
  0x89   :  { %v861_v45 = vld [vmem:[#allocation2 + $0x14] sm:$0xf0]  ;;  %v801_v8 = vld [vmem:[#allocation2 + $0x18] sm:$0xf0]  ;;  %v176_v4 = vsel %vm160_vm11, %v140_v21, %v128_v17  ;;  %vm193_vm12 = vcmp.lt.s32.totalorder %v185_v24, 0  ;;  %vm194_vm13 = vcmp.lt.s32.totalorder %v186_v29, 0 }
  0x8a   :  { %v800_v53 = vor.u32 %v861_v45, %v799_v54  ;;  %v804_v5 = vor.u32 %v860_v62, %v801_v8  ;;  %vm195_vm14 = vcmp.lt.s32.totalorder %v187_v25, 0  ;;  %vm196_vm15 = vcmp.lt.s32.totalorder %v188_v30, 0 }
  0x8b   :  { %v201_v12 = vsel %vm193_vm12, %v173_v2, %v165_v39  ;;  %v202_v61 = vsel %vm194_vm13, %v174_v63, %v166_v32  ;;  %v203_v28 = vsel %vm195_vm14, %v175_v3, %v167_v6  ;;  %v204_v47 = vsel %vm196_vm15, %v176_v4, %v168_v1 }
  0x8c   :  { %703 = vmatpush.bf16.msra.mxu0 %v800_v53  ;;  %717 = vmatpush.bf16.msra.mxu1 %v804_v5  ;;  %v209_v33 = vpack.c.bf16 %v202_v61, %v201_v12  ;;  %v210_v35 = vpack.c.bf16 %v204_v47, %v203_v28  ;;  %v739_v56 = vperm.slane %v737_v7, 0  ;;  %v740_v40 = vperm.slane %v737_v7, 1 }
  0x8e   :  { %213 = vst [vmem:[#allocation2] sm:$0xff] %v209_v33 }
  0x8f   :  { %214 = vst [vmem:[#allocation2 + $0x8] sm:$0xff] %v210_v35 }
  0x95   :  { %v791_v38 = vld [vmem:[#allocation2] sm:$0xf]  ;;  %v858_v34 = vld [vmem:[#allocation2 + $0x4] sm:$0xf] }
  0x96   :  { %v859_v31 = vld [vmem:[#allocation2 + $0x4] sm:$0xf0]  ;;  %v793_v55 = vld [vmem:[#allocation2 + $0x8] sm:$0xf0] }
  0x97   :  { %v792_v11 = vor.u32 %v859_v31, %v791_v38  ;;  %v796_v48 = vor.u32 %v858_v34, %v793_v55 }
  0x99   :  { %704 = vmatpush.bf16.msra.mxu0 %v792_v11  ;;  %718 = vmatpush.bf16.msra.mxu1 %v796_v48 }
  0x9c   :  { %705 = vmatmul.bf16.vlgmr.msra.gmra.mxu0 %v857_v42  ;;  %719 = vmatmul.bf16.vlgmr.msra.gmra.mxu1 %v857_v42 }
 0x119   :  { %v706_v26 = vpop.f32.mrf.mxu0  ;;  %v720_v37 = vpop.f32.mrf.mxu1 }
 0x11a   :  { %v743_v27 = vadd.f32 %v739_v56, %v706_v26  ;;  %v744_v41 = vadd.f32 %v740_v40, %v720_v37 }
 0x11c   :  { %v853_v43 = vclamps-f32 %v743_v27, 65176.48  ;;  %v854_v44 = vclamps-f32 %v744_v41, 65176.48 }
 0x11e   :  { %v755_v9 = vpack.c.bf16 %v854_v44, %v853_v43 }
 0x120   :  { %757 = vst [vmem:[#allocation10] sm:$0xff] %v755_v9 }
 0x121   :  { %v708_v46 = vpop.f32.mrf.mxu0  ;;  %v722_v51 = vpop.f32.mrf.mxu1 }
 0x122   :  { %v745_v0 = vadd.f32 %v739_v56, %v708_v46  ;;  %v746_v49 = vadd.f32 %v740_v40, %v722_v51 }
 0x124   :  { %v855_v50 = vclamps-f32 %v745_v0, 65176.48  ;;  %v856_v57 = vclamps-f32 %v746_v49, 65176.48 }
 0x126   :  { %v756_v58 = vpack.c.bf16 %v856_v57, %v855_v50 }
 0x128   :  { %758 = vst [vmem:[#allocation10 + $0x8] sm:$0xff] %v756_v58 }
 0x129   :  { %771 = dma.vmem_to_hbm [thread:$0]  %s764_s8, 256, %s766_s3, [#allocation6], %s985_s23, %s985_s23, %s986_s24  }
 0x12a   :  { %982 = dma.done.wait [#allocation6], 256  }
 0x12b   :  { %983 = vsyncadd [#allocation6], 4294967040 }
 0x12c   :  { %776 = vsyncpa [#allocation5], 1 }
 0x12d   :  { %777 = vsyncpa [#allocation8], 1 }
 0x12e   :  { %778 = vsyncpa [#allocation6], 1 }

</bundles_post_ra>
